<compile_context>
chip_gen: v7x
topology: tpu7x:2x2x1
jax: 0.10.0
libtpu: 0.0.40
codegen_flags: <defaults>
</compile_context>

<pallas_src>
import functools
import math

import jax
import jax.numpy as jnp
from jax.experimental import pallas as pl
from jax.experimental.pallas import tpu as pltpu


_NEG_INF = -1e9
_MIB = 1024 * 1024
# Weight-resident (full-K) matmul path is used whenever its double-buffered
# working set fits this budget; together with the headroom in _vmem_limit it
# stays well inside v7x's 64 MiB physical VMEM while still being generous on
# v5e/v6e (128 MiB).
_FUSED_BUDGET = 24 * _MIB


# ----------------------------- small helpers -----------------------------

def _gelu(x):
    # erf-based gelu (matches transformers ACT2FN['gelu'])
    return 0.5 * x * (1.0 + jax.lax.erf(x * (1.0 / math.sqrt(2.0))))


def _bytes(shape, dtype):
    n = 1
    for d in shape:
        n *= d
    return n * jnp.dtype(dtype).itemsize


def _vmem_limit(ws_bytes):
    # exact double-buffered working set + headroom for Mosaic internal scratch,
    # floored at the smallest scoped-VMEM default (16 MiB, v5e) and capped so
    # it never crowds v7x's 64 MiB physical VMEM.
    return int(min(40 * _MIB, max(ws_bytes + 8 * _MIB, 16 * _MIB)))


def _pick_tile(dim, target, align):
    """Largest multiple of `align` that divides `dim` and is <= `target`.

    Divisor-aligned tiles keep every MXU tile full and every store lane-dense
    (no ragged last block / masked vst).  Falls back to `target` itself
    (partial edge block -- still correct, Pallas masks it) if no aligned
    divisor exists.
    """
    if dim <= target:
        return dim
    t = (target // align) * align
    while t >= align:
        if dim % t == 0:
            return t
        t -= align
    return (target // align) * align


def _pick_k_tile(k, target=512):
    # reduction tile must evenly divide K (partial blocks on a reduction axis
    # would accumulate padding garbage) and be lane-aligned.  The full-K
    # fallback is correct but pulls the whole K panel into VMEM; it is only
    # reachable through the streaming path (odd hidden sizes).
    if k <= target:
        return k
    t = (target // 128) * 128
    while t >= 128:
        if k % t == 0:
            return t
        t -= 128
    return k


def _pick_q_tile(seq, target=256):
    # query tile must divide S exactly (the kernel slices q rows with pl.ds).
    if seq <= target:
        return seq
    t = (target // 8) * 8
    while t >= 8:
        if seq % t == 0:
            return t
        t -= 8
    return seq


# ----------------------------- matmul epilogues -----------------------------

def _matmul_epilogue(acc, b_ref, act):
    y = acc + b_ref[...].astype(jnp.float32)
    if act == "gelu":
        y = _gelu(y)
    elif act == "relu":
        y = jnp.maximum(y, 0.0)
    return y


def _layernorm(y, g_ref, bt_ref, eps):
    # LN statistics always in f32, even though the activation stream is bf16.
    mean = jnp.mean(y, axis=-1, keepdims=True)
    var = jnp.mean(jnp.square(y - mean), axis=-1, keepdims=True)
    y = (y - mean) * jax.lax.rsqrt(var + eps)
    return y * g_ref[...].astype(jnp.float32) + bt_ref[...].astype(jnp.float32)


# ----------------------- matmul kernels: weight-resident -----------------------

def _linear_fused_kernel(x_ref, w_ref, b_ref, o_ref, *, act):
    """o = act(x @ w + b); full-K weight panel resident in VMEM, no K loop."""
    y = jnp.dot(x_ref[...], w_ref[...], preferred_element_type=jnp.float32)
    o_ref[...] = _matmul_epilogue(y, b_ref, act).astype(o_ref.dtype)


def _linear_ln_fused_kernel(x_ref, w_ref, b_ref, res_ref, g_ref, bt_ref, o_ref,
                            *, act, eps):
    """o = LayerNorm(act(x @ w + b) + residual); full-K weight panel resident."""
    y = jnp.dot(x_ref[...], w_ref[...], preferred_element_type=jnp.float32)
    y = _matmul_epilogue(y, b_ref, act) + res_ref[...].astype(jnp.float32)
    o_ref[...] = _layernorm(y, g_ref, bt_ref, eps).astype(o_ref.dtype)


# ----------------------- matmul kernels: K-streaming fallback -----------------------

def _linear_stream_kernel(x_ref, w_ref, b_ref, o_ref, acc_ref, *, act):
    @pl.when(pl.program_id(2) == 0)
    def _():
        acc_ref[...] = jnp.zeros_like(acc_ref)

    acc_ref[...] += jnp.dot(x_ref[...], w_ref[...],
                            preferred_element_type=jnp.float32)

    @pl.when(pl.program_id(2) == pl.num_programs(2) - 1)
    def _():
        o_ref[...] = _matmul_epilogue(acc_ref[...], b_ref, act).astype(o_ref.dtype)


def _linear_ln_stream_kernel(x_ref, w_ref, b_ref, res_ref, g_ref, bt_ref,
                             o_ref, acc_ref, *, act, eps):
    @pl.when(pl.program_id(2) == 0)
    def _():
        acc_ref[...] = jnp.zeros_like(acc_ref)

    acc_ref[...] += jnp.dot(x_ref[...], w_ref[...],
                            preferred_element_type=jnp.float32)

    @pl.when(pl.program_id(2) == pl.num_programs(2) - 1)
    def _():
        y = _matmul_epilogue(acc_ref[...], b_ref, act) + res_ref[...].astype(jnp.float32)
        o_ref[...] = _layernorm(y, g_ref, bt_ref, eps).astype(o_ref.dtype)


# ----------------------------- linear wrapper -----------------------------

def linear(x, w, b, *, act="none", residual=None, ln=None, eps=1e-12,
           out_dtype=jnp.bfloat16):
    """Tiled y = act(x @ w + b), optionally fused with LayerNorm(y + residual).

    x, w (and residual) are bf16; accumulation / bias / act / LN math is f32.
    """
    M, K = x.shape
    Kw, N = w.shape
    assert K == Kw
    tm = _pick_tile(M, 512, 8)
    tn = N if ln is not None else _pick_tile(N, 1024, 128)  # LN needs the full row
    n_i = pl.cdiv(M, tm)
    n_j = pl.cdiv(N, tn)

    ln_extra = 0
    if ln is not None:
        ln_extra = (2 * _bytes((tm, N), residual.dtype)
                    + 4 * _bytes((1, N), jnp.float32))

    # ---- primary path: full-K weight panel resident across the i loop ----
    ws_fused = (2 * _bytes((tm, K), x.dtype) + 2 * _bytes((K, tn), w.dtype)
                + 2 * _bytes((1, tn), jnp.float32) + 2 * _bytes((tm, tn), out_dtype)
                + _bytes((tm, tn), jnp.float32) + ln_extra)
    if ws_fused <= _FUSED_BUDGET:
        grid = (n_j, n_i)  # j outermost: weight block index constant across i
        x_spec = pl.BlockSpec((tm, K), lambda j, i: (i, 0))
        w_spec = pl.BlockSpec((K, tn), lambda j, i: (0, j))
        b_spec = pl.BlockSpec((1, tn), lambda j, i: (0, j))
        o_spec = pl.BlockSpec((tm, tn), lambda j, i: (i, j))
        params = pltpu.CompilerParams(
            dimension_semantics=("parallel", "parallel"),
            vmem_limit_bytes=_vmem_limit(ws_fused),
        )
        if ln is None:
            kernel = functools.partial(_linear_fused_kernel, act=act)
            in_specs = [x_spec, w_spec, b_spec]
            operands = (x, w, b.reshape(1, N))
        else:
            gamma, beta = ln
            kernel = functools.partial(_linear_ln_fused_kernel, act=act, eps=eps)
            res_spec = pl.BlockSpec((tm, N), lambda j, i: (i, 0))
            gb_spec = pl.BlockSpec((1, N), lambda j, i: (0, 0))
            in_specs = [x_spec, w_spec, b_spec, res_spec, gb_spec, gb_spec]
            operands = (x, w, b.reshape(1, N), residual,
                        gamma.reshape(1, N), beta.reshape(1, N))
        return pl.pallas_call(
            kernel,
            out_shape=jax.ShapeDtypeStruct((M, N), out_dtype),
            grid=grid,
            in_specs=in_specs,
            out_specs=o_spec,
            compiler_params=params,
        )(*operands)

    # ---- fallback: stream K in tk chunks with a f32 VMEM accumulator ----
    tk = _pick_k_tile(K)
    grid = (n_i, n_j, pl.cdiv(K, tk))
    x_spec = pl.BlockSpec((tm, tk), lambda i, j, k: (i, k))
    w_spec = pl.BlockSpec((tk, tn), lambda i, j, k: (k, j))
    b_spec = pl.BlockSpec((1, tn), lambda i, j, k: (0, j))
    o_spec = pl.BlockSpec((tm, tn), lambda i, j, k: (i, j))

    ws = (2 * (_bytes((tm, tk), x.dtype) + _bytes((tk, tn), w.dtype)
               + _bytes((1, tn), jnp.float32) + _bytes((tm, tn), out_dtype))
          + _bytes((tm, tn), jnp.float32) + ln_extra)
    params = pltpu.CompilerParams(
        dimension_semantics=("parallel", "parallel", "arbitrary"),
        vmem_limit_bytes=_vmem_limit(ws),
    )

    if ln is None:
        kernel = functools.partial(_linear_stream_kernel, act=act)
        in_specs = [x_spec, w_spec, b_spec]
        operands = (x, w, b.reshape(1, N))
    else:
        gamma, beta = ln
        kernel = functools.partial(_linear_ln_stream_kernel, act=act, eps=eps)
        res_spec = pl.BlockSpec((tm, N), lambda i, j, k: (i, 0))
        gb_spec = pl.BlockSpec((1, N), lambda i, j, k: (0, 0))
        in_specs = [x_spec, w_spec, b_spec, res_spec, gb_spec, gb_spec]
        operands = (x, w, b.reshape(1, N), residual,
                    gamma.reshape(1, N), beta.reshape(1, N))

    return pl.pallas_call(
        kernel,
        out_shape=jax.ShapeDtypeStruct((M, N), out_dtype),
        grid=grid,
        in_specs=in_specs,
        out_specs=o_spec,
        scratch_shapes=[pltpu.VMEM((tm, tn), jnp.float32)],
        compiler_params=params,
    )(*operands)


# ----------------------------- attention kernel -----------------------------

def _attention_kernel(qkv_ref, bias_ref, o_ref, ctx_ref,
                      *, num_heads, head_dim, scale, q_tile):
    """All heads of one (batch, query-tile) grid step.

    qkv_ref : (S, 3H) bf16 -- full sequence, fused [Q | K | V] projection
    bias_ref: (1, 1 or tq, S) additive mask bias (broadcasts over queries)
    o_ref   : (tq, H) bf16 -- single lane-dense context store
    ctx_ref : (tq, H) f32 VMEM scratch -- each head writes its slice here, so
              only one head's (tq, S) score/prob tensors are live at a time
              and no final concatenate relayout is needed.
    """
    H = num_heads * head_dim
    q_start = pl.multiple_of(pl.program_id(1) * q_tile, q_tile)
    q_rows = qkv_ref[pl.ds(q_start, q_tile), :]       # (tq, 3H)
    kv = qkv_ref[...]                                 # (S, 3H)
    bias = bias_ref[0].astype(jnp.float32)            # (1 | tq, S)

    # TODO(synk): for long sequences (S >= ~1024) switch to a KV-tiled
    # online-softmax (flash) accumulator, and on v6e the exp/prob path could
    # run in bf16 (kept f32 here so the same kernel is correct on v5e).
    for h in range(num_heads):
        lo = h * head_dim
        q = q_rows[:, lo:lo + head_dim] * scale       # scale folded into q (tq, dH)
        k = kv[:, H + lo:H + lo + head_dim]
        v = kv[:, 2 * H + lo:2 * H + lo + head_dim]
        # contract the last dims directly -- no k.T transpose through the XLU
        s = jax.lax.dot_general(q, k, (((1,), (1,)), ((), ())),
                                preferred_element_type=jnp.float32) + bias
        s = s - jnp.max(s, axis=-1, keepdims=True)
        p = jnp.exp(s)
        p = p * pl.reciprocal(jnp.sum(p, axis=-1, keepdims=True), approx=True)
        ctx_ref[:, lo:lo + head_dim] = jnp.dot(p.astype(kv.dtype), v,
                                               preferred_element_type=jnp.float32)

    o_ref[...] = ctx_ref[...].astype(o_ref.dtype)


def attention(qkv, bias, *, num_heads, batch, seq):
    """Multi-head self-attention over the fused QKV projection.

    qkv  : (B*S, 3H) bf16
    bias : (B, 1, S) f32 (key-only) or (B, S, S) bf16 additive mask bias
    out  : (B*S, H) bf16
    """
    BS, H3 = qkv.shape
    assert BS == batch * seq
    H = H3 // 3
    head_dim = H // num_heads
    scale = 1.0 / math.sqrt(head_dim)

    tq = _pick_q_tile(seq)
    n_q = seq // tq
    sb = bias.shape[1]  # 1 (key-only) or seq (full (B,S,S) mask)

    # Full-sequence QKV block: its block index only depends on the batch axis,
    # so across the inner query-tile axis the DMA is skipped (fetched once per
    # batch element).
    qkv_spec = pl.BlockSpec((seq, H3), lambda b, qi: (b, 0))
    if sb == 1:
        bias_spec = pl.BlockSpec((1, 1, seq), lambda b, qi: (b, 0, 0))
    else:
        bias_spec = pl.BlockSpec((1, tq, seq), lambda b, qi: (b, qi, 0))
    out_spec = pl.BlockSpec((tq, H), lambda b, qi: (b * n_q + qi, 0))

    ws = (2 * _bytes((seq, H3), qkv.dtype)
          + 2 * _bytes((1, min(sb, tq), seq), bias.dtype)
          + 2 * _bytes((tq, H), jnp.bfloat16)
          + _bytes((tq, H), jnp.float32)
          + 4 * tq * seq * 4)  # per-head score / exp / prob temporaries
    params = pltpu.CompilerParams(
        dimension_semantics=("parallel", "parallel"),
        vmem_limit_bytes=_vmem_limit(ws),
    )
    kernel = functools.partial(_attention_kernel, num_heads=num_heads,
                               head_dim=head_dim, scale=scale, q_tile=tq)
    return pl.pallas_call(
        kernel,
        out_shape=jax.ShapeDtypeStruct((BS, H), jnp.bfloat16),
        grid=(batch, n_q),
        in_specs=[qkv_spec, bias_spec],
        out_specs=out_spec,
        scratch_shapes=[pltpu.VMEM((tq, H), jnp.float32)],
        compiler_params=params,
    )(qkv, bias)


# ----------------------------- model definition -----------------------------

class Config:
    def __init__(self, hidden_size=64, num_hidden_layers=2, num_attention_heads=4,
                 intermediate_size=256, hidden_act="gelu", layer_norm_eps=1e-12,
                 initializer_range=0.02, hidden_dropout_prob=0.0,
                 attention_probs_dropout_prob=0.0):
        assert hidden_size % num_attention_heads == 0
        self.hidden_size = hidden_size
        self.num_hidden_layers = num_hidden_layers
        self.num_attention_heads = num_attention_heads
        self.intermediate_size = intermediate_size
        self.hidden_act = hidden_act
        self.layer_norm_eps = layer_norm_eps
        self.initializer_range = initializer_range
        self.hidden_dropout_prob = hidden_dropout_prob
        self.attention_probs_dropout_prob = attention_probs_dropout_prob


def init_params(cfg, key):
    H, I = cfg.hidden_size, cfg.intermediate_size
    std = cfg.initializer_range
    ki = iter(jax.random.split(key, 4 * cfg.num_hidden_layers))

    def lin(kin, kout):
        # stored as (in, out) so the kernel computes x @ W + b (== torch x @ W.T + b)
        w = jax.random.normal(next(ki), (kin, kout), jnp.float32) * std
        return w.astype(jnp.bfloat16), jnp.zeros((kout,), jnp.float32)

    layers = []
    for _ in range(cfg.num_hidden_layers):
        qkv_w, qkv_b = lin(H, 3 * H)          # fused query/key/value projection
        ao_w, ao_b = lin(H, H)
        in_w, in_b = lin(H, I)
        out_w, out_b = lin(I, H)
        layers.append({
            "qkv_w": qkv_w, "qkv_b": qkv_b,
            "attn_out_w": ao_w, "attn_out_b": ao_b,
            "attn_ln": (jnp.ones((H,), jnp.float32), jnp.zeros((H,), jnp.float32)),
            "inter_w": in_w, "inter_b": in_b,
            "out_w": out_w, "out_b": out_b,
            "out_ln": (jnp.ones((H,), jnp.float32), jnp.zeros((H,), jnp.float32)),
        })
    return {"layers": layers}


def _mask_to_bias(attention_mask):
    f32 = jnp.float32
    if attention_mask.ndim == 2:
        # key-only mask (B, S) -> compact (B, 1, S) bias, ~S x less HBM traffic
        return ((1.0 - attention_mask.astype(f32)) * f32(_NEG_INF))[:, None, :]
    # full (B, S, S) mask -> bf16 bias to halve its DMA footprint
    return ((1.0 - attention_mask.astype(f32)) * f32(_NEG_INF)).astype(jnp.bfloat16)


def bert_encoder_forward(params, cfg, hidden_states, attention_mask):
    B, S, H = hidden_states.shape
    nH = cfg.num_attention_heads
    eps = cfg.layer_norm_eps

    bias = _mask_to_bias(attention_mask)

    # bf16 activation stream between kernels (accumulation / LN stays f32)
    x = hidden_states.astype(jnp.bfloat16).reshape(B * S, H)
    for layer in params["layers"]:
        # fused Q/K/V projection: one matmul, x read from HBM once
        qkv = linear(x, layer["qkv_w"], layer["qkv_b"], out_dtype=jnp.bfloat16)
        ctx = attention(qkv, bias, num_heads=nH, batch=B, seq=S)
        # attention output dense + residual + LayerNorm fused in one kernel
        x = linear(ctx, layer["attn_out_w"], layer["attn_out_b"],
                   residual=x, ln=layer["attn_ln"], eps=eps, out_dtype=jnp.bfloat16)
        # intermediate dense + GELU fused
        inter = linear(x, layer["inter_w"], layer["inter_b"], act=cfg.hidden_act,
                       out_dtype=jnp.bfloat16)
        # output dense + residual + LayerNorm fused
        x = linear(inter, layer["out_w"], layer["out_b"],
                   residual=x, ln=layer["out_ln"], eps=eps, out_dtype=jnp.bfloat16)
    return x.reshape(B, S, H).astype(jnp.float32)


# ----------------------------- pure-JAX reference -----------------------------

def reference_forward(params, cfg, hidden_states, attention_mask):
    B, S, H = hidden_states.shape
    nH = cfg.num_attention_heads
    dH = H // nH
    eps = cfg.layer_norm_eps
    f32 = jnp.float32

    if attention_mask.ndim == 2:
        bias = ((1.0 - attention_mask.astype(f32)) * f32(_NEG_INF))[:, None, :]
    else:
        bias = (1.0 - attention_mask.astype(f32)) * f32(_NEG_INF)

    def ln(y, gamma, beta):
        mu = jnp.mean(y, -1, keepdims=True)
        var = jnp.mean(jnp.square(y - mu), -1, keepdims=True)
        return (y - mu) * jax.lax.rsqrt(var + eps) * gamma + beta

    x = hidden_states.astype(f32)
    for layer in params["layers"]:
        qkv = x @ layer["qkv_w"].astype(f32) + layer["qkv_b"]
        q, k, v = jnp.split(qkv, 3, axis=-1)
        split = lambda t: t.reshape(B, S, nH, dH).transpose(0, 2, 1, 3)
        qh, kh, vh = split(q), split(k), split(v)
        s = jnp.einsum("bhqd,bhkd->bhqk", qh, kh) / math.sqrt(dH) + bias[:, None]
        p = jax.nn.softmax(s, axis=-1)
        ctx = jnp.einsum("bhqk,bhkd->bhqd", p, vh).transpose(0, 2, 1, 3).reshape(B, S, H)
        a = ctx @ layer["attn_out_w"].astype(f32) + layer["attn_out_b"]
        x = ln(a + x, *layer["attn_ln"])
        inter = _gelu(x @ layer["inter_w"].astype(f32) + layer["inter_b"])
        o = inter @ layer["out_w"].astype(f32) + layer["out_b"]
        x = ln(o + x, *layer["out_ln"])
    return x


# ----------------------------- demo -----------------------------

if __name__ == "__main__":
    cfg = Config(hidden_size=64, num_hidden_layers=2, num_attention_heads=4,
                 intermediate_size=256)
    B, S = 2, 16

    key = jax.random.PRNGKey(0)
    k_params, k_hidden = jax.random.split(key)
    params = init_params(cfg, k_params)

    hidden_states = jax.random.normal(k_hidden, (B, S, cfg.hidden_size), jnp.float32)
    lengths = jnp.array([S, S - 4], jnp.int32)
    key_mask = (jnp.arange(S)[None, :] < lengths[:, None]).astype(jnp.float32)   # (B, S)
    full_mask = jnp.broadcast_to(key_mask[:, None, :], (B, S, S))                # (B, S, S)

    fwd = jax.jit(functools.partial(bert_encoder_forward, params, cfg))

    # canonical (B, S, S) mask (original module interface)
    out_full = jax.block_until_ready(fwd(hidden_states, full_mask))
    # compact (B, S) key mask -> (B, 1, S) bias path
    out_key = jax.block_until_ready(fwd(hidden_states, key_mask))

    assert out_full.shape == (B, S, cfg.hidden_size)
    assert bool(jnp.all(jnp.isfinite(out_full)))
    assert bool(jnp.all(jnp.isfinite(out_key)))

    ref = reference_forward(params, cfg, hidden_states, full_mask)
    err_full = float(jnp.max(jnp.abs(out_full - ref)))
    err_key = float(jnp.max(jnp.abs(out_key - ref)))
    assert err_full < 5e-2, f"max abs error (full mask) vs reference: {err_full}"
    assert err_key < 5e-2, f"max abs error (key mask) vs reference: {err_key}"

    print("KERNEL_OK")
</pallas_src>

<mosaic_0001>
module attributes {stable_mosaic.version = 11 : i64} {
  func.func @_linear_fused_kernel(%arg0: i32, %arg1: i32, %arg2: memref<32x64xbf16, #tpu.memory_space<vmem>>, %arg3: memref<64x192xbf16, #tpu.memory_space<vmem>>, %arg4: memref<1x192xf32, #tpu.memory_space<vmem>>, %arg5: memref<32x192xbf16, #tpu.memory_space<vmem>>) attributes {dimension_semantics = [#tpu.dimension_semantics<parallel>, #tpu.dimension_semantics<parallel>], iteration_bounds = array<i64: 1, 1>, scalar_prefetch = 0 : i64, scratch_operands = 0 : i64, tpu.core_type = #tpu.core_type<tc>, window_params = [{transform_indices = @transform_0, window_bounds = array<i64: 32, 64>}, {transform_indices = @transform_1, window_bounds = array<i64: 64, 192>}, {transform_indices = @transform_2, window_bounds = array<i64: 1, 192>}, {transform_indices = @transform_3, window_bounds = array<i64: 32, 192>}]} {
    %c0 = arith.constant 0 : index
    %c0_0 = arith.constant 0 : index
    %0 = vector.load %arg2[%c0, %c0_0] : memref<32x64xbf16, #tpu.memory_space<vmem>>, vector<32x64xbf16>
    %c0_1 = arith.constant 0 : index
    %c0_2 = arith.constant 0 : index
    %1 = vector.load %arg3[%c0_1, %c0_2] : memref<64x192xbf16, #tpu.memory_space<vmem>>, vector<64x192xbf16>
    %cst = arith.constant dense<0.000000e+00> : vector<32x192xf32>
    %2 = tpu.matmul %0, %1, %cst {dimension_numbers = #tpu.dot_dimension_numbers<[1], [0], [0], [1], [0, 0, 1, 1], [], []>} : vector<32x64xbf16>, vector<64x192xbf16>, vector<32x192xf32> -> vector<32x192xf32>
    %c0_3 = arith.constant 0 : index
    %c0_4 = arith.constant 0 : index
    %3 = vector.load %arg4[%c0_3, %c0_4] : memref<1x192xf32, #tpu.memory_space<vmem>>, vector<1x192xf32>
    %4 = vector.broadcast %3 : vector<1x192xf32> to vector<32x192xf32>
    %5 = arith.addf %2, %4 : vector<32x192xf32>
    %6 = arith.truncf %5 : vector<32x192xf32> to vector<32x192xbf16>
    %c0_5 = arith.constant 0 : index
    %c0_6 = arith.constant 0 : index
    %7 = vector.load %arg5[%c0_5, %c0_6] : memref<32x192xbf16, #tpu.memory_space<vmem>>, vector<32x192xbf16>
    tpu.vector_store %arg5[%c0_5, %c0_6], %6 {strides = array<i32>} : memref<32x192xbf16, #tpu.memory_space<vmem>>, vector<32x192xbf16>,
    return
  }
  func.func @transform_0(%arg0: i32, %arg1: i32) -> (i32, i32) {
    %c0_i32 = arith.constant 0 : i32
    %c0_i32_0 = arith.constant 0 : i32
    return %arg1, %c0_i32 : i32, i32
  }
  func.func @transform_1(%arg0: i32, %arg1: i32) -> (i32, i32) {
    %c0_i32 = arith.constant 0 : i32
    %c0_i32_0 = arith.constant 0 : i32
    return %c0_i32, %arg0 : i32, i32
  }
  func.func @transform_2(%arg0: i32, %arg1: i32) -> (i32, i32) {
    %c0_i32 = arith.constant 0 : i32
    %c0_i32_0 = arith.constant 0 : i32
    return %c0_i32, %arg0 : i32, i32
  }
  func.func @transform_3(%arg0: i32, %arg1: i32) -> (i32, i32) {
    %c0_i32 = arith.constant 0 : i32
    return %arg1, %arg0 : i32, i32
  }
}

module attributes {stable_mosaic.version = 11 : i64} {
  func.func @_attention_kernel(%arg0: i32, %arg1: i32, %arg2: memref<16x192xbf16, #tpu.memory_space<vmem>>, %arg3: memref<1x16x16xbf16, #tpu.memory_space<vmem>>, %arg4: memref<16x64xbf16, #tpu.memory_space<vmem>>, %arg5: memref<16x64xf32, #tpu.memory_space<vmem>>) attributes {dimension_semantics = [#tpu.dimension_semantics<parallel>, #tpu.dimension_semantics<parallel>], iteration_bounds = array<i64: 2, 1>, scalar_prefetch = 0 : i64, scratch_operands = 1 : i64, tpu.core_type = #tpu.core_type<tc>, window_params = [{transform_indices = @transform_0, window_bounds = array<i64: 16, 192>}, {transform_indices = @transform_1, window_bounds = array<i64: 1, 16, 16>}, {transform_indices = @transform_2, window_bounds = array<i64: 16, 64>}]} {
    %c16_i32 = arith.constant 16 : i32
    %0 = arith.muli %arg1, %c16_i32 : i32
    %1 = tpu.assume_multiple %0, 16 : i32
    %2 = arith.index_cast %1 : i32 to index
    %c0 = arith.constant 0 : index
    %3 = vector.load %arg2[%2, %c0] : memref<16x192xbf16, #tpu.memory_space<vmem>>, vector<16x192xbf16>
    %c0_0 = arith.constant 0 : index
    %c0_1 = arith.constant 0 : index
    %4 = vector.load %arg2[%c0_0, %c0_1] : memref<16x192xbf16, #tpu.memory_space<vmem>>, vector<16x192xbf16>
    %c0_2 = arith.constant 0 : index
    %c0_3 = arith.constant 0 : index
    %c0_4 = arith.constant 0 : index
    %5 = vector.load %arg3[%c0_2, %c0_3, %c0_4] : memref<1x16x16xbf16, #tpu.memory_space<vmem>>, vector<1x16x16xbf16>
    %6 = vector.shape_cast %5 : vector<1x16x16xbf16> to vector<16x16xbf16>
    %7 = arith.extf %6 : vector<16x16xbf16> to vector<16x16xf32>
    %8 = vector.extract_strided_slice %3 {offsets = [0, 0], sizes = [16, 16], strides = [1, 1]} : vector<16x192xbf16> to vector<16x16xbf16>
    %cst = arith.constant 2.500000e-01 : bf16
    %9 = vector.broadcast %cst : bf16 to vector<16x16xbf16>
    %10 = arith.mulf %8, %9 : vector<16x16xbf16>
    %11 = vector.extract_strided_slice %4 {offsets = [0, 64], sizes = [16, 16], strides = [1, 1]} : vector<16x192xbf16> to vector<16x16xbf16>
    %12 = vector.extract_strided_slice %4 {offsets = [0, 128], sizes = [16, 16], strides = [1, 1]} : vector<16x192xbf16> to vector<16x16xbf16>
    %cst_5 = arith.constant dense<0.000000e+00> : vector<16x16xf32>
    %13 = tpu.matmul %10, %11, %cst_5 {dimension_numbers = #tpu.dot_dimension_numbers<[1], [1], [0], [0], [0, 0, 1, 0], [], []>} : vector<16x16xbf16>, vector<16x16xbf16>, vector<16x16xf32> -> vector<16x16xf32>
    %14 = arith.addf %13, %7 : vector<16x16xf32>
    %cst_6 = arith.constant dense<0xFF800000> : vector<16xf32>
    %15 = vector.multi_reduction <maximumf>, %14, %cst_6 [1] : vector<16x16xf32> to vector<16xf32>
    %16 = vector.shape_cast %15 : vector<16xf32> to vector<16x1xf32>
    %17 = vector.broadcast %16 : vector<16x1xf32> to vector<16x16xf32>
    %18 = arith.subf %14, %17 : vector<16x16xf32>
    %19 = math.exp %18 : vector<16x16xf32>
    %cst_7 = arith.constant dense<0.000000e+00> : vector<16xf32>
    %20 = vector.multi_reduction <add>, %19, %cst_7 [1] : vector<16x16xf32> to vector<16xf32>
    %21 = vector.shape_cast %20 : vector<16xf32> to vector<16x1xf32>
    %22 = tpu.reciprocal %21 {approx = true} : vector<16x1xf32> -> vector<16x1xf32>
    %23 = vector.broadcast %22 : vector<16x1xf32> to vector<16x16xf32>
    %24 = arith.mulf %19, %23 : vector<16x16xf32>
    %25 = arith.truncf %24 : vector<16x16xf32> to vector<16x16xbf16>
    %cst_8 = arith.constant dense<0.000000e+00> : vector<16x16xf32>
    %26 = tpu.matmul %25, %12, %cst_8 {dimension_numbers = #tpu.dot_dimension_numbers<[1], [0], [0], [1], [0, 0, 1, 1], [], []>} : vector<16x16xbf16>, vector<16x16xbf16>, vector<16x16xf32> -> vector<16x16xf32>
    %c0_9 = arith.constant 0 : index
    %c0_10 = arith.constant 0 : index
    %27 = vector.load %arg5[%c0_9, %c0_10] : memref<16x64xf32, #tpu.memory_space<vmem>>, vector<16x16xf32>
    tpu.vector_store %arg5[%c0_9, %c0_10], %26 {strides = array<i32>} : memref<16x64xf32, #tpu.memory_space<vmem>>, vector<16x16xf32>,
    %28 = vector.extract_strided_slice %3 {offsets = [0, 16], sizes = [16, 16], strides = [1, 1]} : vector<16x192xbf16> to vector<16x16xbf16>
    %cst_11 = arith.constant 2.500000e-01 : bf16
    %29 = vector.broadcast %cst_11 : bf16 to vector<16x16xbf16>
    %30 = arith.mulf %28, %29 : vector<16x16xbf16>
    %31 = vector.extract_strided_slice %4 {offsets = [0, 80], sizes = [16, 16], strides = [1, 1]} : vector<16x192xbf16> to vector<16x16xbf16>
    %32 = vector.extract_strided_slice %4 {offsets = [0, 144], sizes = [16, 16], strides = [1, 1]} : vector<16x192xbf16> to vector<16x16xbf16>
    %cst_12 = arith.constant dense<0.000000e+00> : vector<16x16xf32>
    %33 = tpu.matmul %30, %31, %cst_12 {dimension_numbers = #tpu.dot_dimension_numbers<[1], [1], [0], [0], [0, 0, 1, 0], [], []>} : vector<16x16xbf16>, vector<16x16xbf16>, vector<16x16xf32> -> vector<16x16xf32>
    %34 = arith.addf %33, %7 : vector<16x16xf32>
    %cst_13 = arith.constant dense<0xFF800000> : vector<16xf32>
    %35 = vector.multi_reduction <maximumf>, %34, %cst_13 [1] : vector<16x16xf32> to vector<16xf32>
    %36 = vector.shape_cast %35 : vector<16xf32> to vector<16x1xf32>
    %37 = vector.broadcast %36 : vector<16x1xf32> to vector<16x16xf32>
    %38 = arith.subf %34, %37 : vector<16x16xf32>
    %39 = math.exp %38 : vector<16x16xf32>
    %cst_14 = arith.constant dense<0.000000e+00> : vector<16xf32>
    %40 = vector.multi_reduction <add>, %39, %cst_14 [1] : vector<16x16xf32> to vector<16xf32>
    %41 = vector.shape_cast %40 : vector<16xf32> to vector<16x1xf32>
    %42 = tpu.reciprocal %41 {approx = true} : vector<16x1xf32> -> vector<16x1xf32>
    %43 = vector.broadcast %42 : vector<16x1xf32> to vector<16x16xf32>
    %44 = arith.mulf %39, %43 : vector<16x16xf32>
    %45 = arith.truncf %44 : vector<16x16xf32> to vector<16x16xbf16>
    %cst_15 = arith.constant dense<0.000000e+00> : vector<16x16xf32>
    %46 = tpu.matmul %45, %32, %cst_15 {dimension_numbers = #tpu.dot_dimension_numbers<[1], [0], [0], [1], [0, 0, 1, 1], [], []>} : vector<16x16xbf16>, vector<16x16xbf16>, vector<16x16xf32> -> vector<16x16xf32>
    %c0_16 = arith.constant 0 : index
    %c16 = arith.constant 16 : index
    %47 = vector.load %arg5[%c0_16, %c16] : memref<16x64xf32, #tpu.memory_space<vmem>>, vector<16x16xf32>
    tpu.vector_store %arg5[%c0_16, %c16], %46 {strides = array<i32>} : memref<16x64xf32, #tpu.memory_space<vmem>>, vector<16x16xf32>,
    %48 = vector.extract_strided_slice %3 {offsets = [0, 32], sizes = [16, 16], strides = [1, 1]} : vector<16x192xbf16> to vector<16x16xbf16>
    %cst_17 = arith.constant 2.500000e-01 : bf16
    %49 = vector.broadcast %cst_17 : bf16 to vector<16x16xbf16>
    %50 = arith.mulf %48, %49 : vector<16x16xbf16>
    %51 = vector.extract_strided_slice %4 {offsets = [0, 96], sizes = [16, 16], strides = [1, 1]} : vector<16x192xbf16> to vector<16x16xbf16>
    %52 = vector.extract_strided_slice %4 {offsets = [0, 160], sizes = [16, 16], strides = [1, 1]} : vector<16x192xbf16> to vector<16x16xbf16>
    %cst_18 = arith.constant dense<0.000000e+00> : vector<16x16xf32>
    %53 = tpu.matmul %50, %51, %cst_18 {dimension_numbers = #tpu.dot_dimension_numbers<[1], [1], [0], [0], [0, 0, 1, 0], [], []>} : vector<16x16xbf16>, vector<16x16xbf16>, vector<16x16xf32> -> vector<16x16xf32>
    %54 = arith.addf %53, %7 : vector<16x16xf32>
    %cst_19 = arith.constant dense<0xFF800000> : vector<16xf32>
    %55 = vector.multi_reduction <maximumf>, %54, %cst_19 [1] : vector<16x16xf32> to vector<16xf32>
    %56 = vector.shape_cast %55 : vector<16xf32> to vector<16x1xf32>
    %57 = vector.broadcast %56 : vector<16x1xf32> to vector<16x16xf32>
    %58 = arith.subf %54, %57 : vector<16x16xf32>
    %59 = math.exp %58 : vector<16x16xf32>
    %cst_20 = arith.constant dense<0.000000e+00> : vector<16xf32>
    %60 = vector.multi_reduction <add>, %59, %cst_20 [1] : vector<16x16xf32> to vector<16xf32>
    %61 = vector.shape_cast %60 : vector<16xf32> to vector<16x1xf32>
    %62 = tpu.reciprocal %61 {approx = true} : vector<16x1xf32> -> vector<16x1xf32>
    %63 = vector.broadcast %62 : vector<16x1xf32> to vector<16x16xf32>
    %64 = arith.mulf %59, %63 : vector<16x16xf32>
    %65 = arith.truncf %64 : vector<16x16xf32> to vector<16x16xbf16>
    %cst_21 = arith.constant dense<0.000000e+00> : vector<16x16xf32>
    %66 = tpu.matmul %65, %52, %cst_21 {dimension_numbers = #tpu.dot_dimension_numbers<[1], [0], [0], [1], [0, 0, 1, 1], [], []>} : vector<16x16xbf16>, vector<16x16xbf16>, vector<16x16xf32> -> vector<16x16xf32>
    %c0_22 = arith.constant 0 : index
    %c32 = arith.constant 32 : index
    %67 = vector.load %arg5[%c0_22, %c32] : memref<16x64xf32, #tpu.memory_space<vmem>>, vector<16x16xf32>
    tpu.vector_store %arg5[%c0_22, %c32], %66 {strides = array<i32>} : memref<16x64xf32, #tpu.memory_space<vmem>>, vector<16x16xf32>,
    %68 = vector.extract_strided_slice %3 {offsets = [0, 48], sizes = [16, 16], strides = [1, 1]} : vector<16x192xbf16> to vector<16x16xbf16>
    %cst_23 = arith.constant 2.500000e-01 : bf16
    %69 = vector.broadcast %cst_23 : bf16 to vector<16x16xbf16>
    %70 = arith.mulf %68, %69 : vector<16x16xbf16>
    %71 = vector.extract_strided_slice %4 {offsets = [0, 112], sizes = [16, 16], strides = [1, 1]} : vector<16x192xbf16> to vector<16x16xbf16>
    %72 = vector.extract_strided_slice %4 {offsets = [0, 176], sizes = [16, 16], strides = [1, 1]} : vector<16x192xbf16> to vector<16x16xbf16>
    %cst_24 = arith.constant dense<0.000000e+00> : vector<16x16xf32>
    %73 = tpu.matmul %70, %71, %cst_24 {dimension_numbers = #tpu.dot_dimension_numbers<[1], [1], [0], [0], [0, 0, 1, 0], [], []>} : vector<16x16xbf16>, vector<16x16xbf16>, vector<16x16xf32> -> vector<16x16xf32>
    %74 = arith.addf %73, %7 : vector<16x16xf32>
    %cst_25 = arith.constant dense<0xFF800000> : vector<16xf32>
    %75 = vector.multi_reduction <maximumf>, %74, %cst_25 [1] : vector<16x16xf32> to vector<16xf32>
    %76 = vector.shape_cast %75 : vector<16xf32> to vector<16x1xf32>
    %77 = vector.broadcast %76 : vector<16x1xf32> to vector<16x16xf32>
    %78 = arith.subf %74, %77 : vector<16x16xf32>
    %79 = math.exp %78 : vector<16x16xf32>
    %cst_26 = arith.constant dense<0.000000e+00> : vector<16xf32>
    %80 = vector.multi_reduction <add>, %79, %cst_26 [1] : vector<16x16xf32> to vector<16xf32>
    %81 = vector.shape_cast %80 : vector<16xf32> to vector<16x1xf32>
    %82 = tpu.reciprocal %81 {approx = true} : vector<16x1xf32> -> vector<16x1xf32>
    %83 = vector.broadcast %82 : vector<16x1xf32> to vector<16x16xf32>
    %84 = arith.mulf %79, %83 : vector<16x16xf32>
    %85 = arith.truncf %84 : vector<16x16xf32> to vector<16x16xbf16>
    %cst_27 = arith.constant dense<0.000000e+00> : vector<16x16xf32>
    %86 = tpu.matmul %85, %72, %cst_27 {dimension_numbers = #tpu.dot_dimension_numbers<[1], [0], [0], [1], [0, 0, 1, 1], [], []>} : vector<16x16xbf16>, vector<16x16xbf16>, vector<16x16xf32> -> vector<16x16xf32>
    %c0_28 = arith.constant 0 : index
    %c48 = arith.constant 48 : index
    %87 = vector.load %arg5[%c0_28, %c48] : memref<16x64xf32, #tpu.memory_space<vmem>>, vector<16x16xf32>
    tpu.vector_store %arg5[%c0_28, %c48], %86 {strides = array<i32>} : memref<16x64xf32, #tpu.memory_space<vmem>>, vector<16x16xf32>,
    %c0_29 = arith.constant 0 : index
    %c0_30 = arith.constant 0 : index
    %88 = vector.load %arg5[%c0_29, %c0_30] : memref<16x64xf32, #tpu.memory_space<vmem>>, vector<16x64xf32>
    %89 = arith.truncf %88 : vector<16x64xf32> to vector<16x64xbf16>
    %c0_31 = arith.constant 0 : index
    %c0_32 = arith.constant 0 : index
    %90 = vector.load %arg4[%c0_31, %c0_32] : memref<16x64xbf16, #tpu.memory_space<vmem>>, vector<16x64xbf16>
    tpu.vector_store %arg4[%c0_31, %c0_32], %89 {strides = array<i32>} : memref<16x64xbf16, #tpu.memory_space<vmem>>, vector<16x64xbf16>,
    return
  }
  func.func @transform_0(%arg0: i32, %arg1: i32) -> (i32, i32) {
    %c0_i32 = arith.constant 0 : i32
    %c0_i32_0 = arith.constant 0 : i32
    return %arg0, %c0_i32 : i32, i32
  }
  func.func @transform_1(%arg0: i32, %arg1: i32) -> (i32, i32, i32) {
    %c0_i32 = arith.constant 0 : i32
    %c0_i32_0 = arith.constant 0 : i32
    return %arg0, %arg1, %c0_i32 : i32, i32, i32
  }
  func.func @transform_2(%arg0: i32, %arg1: i32) -> (i32, i32) {
    %c1_i32 = arith.constant 1 : i32
    %0 = arith.muli %arg0, %c1_i32 : i32
    %1 = arith.addi %0, %arg1 : i32
    %c0_i32 = arith.constant 0 : i32
    %c0_i32_0 = arith.constant 0 : i32
    return %1, %c0_i32 : i32, i32
  }
}

module attributes {stable_mosaic.version = 11 : i64} {
  func.func @_linear_ln_fused_kernel(%arg0: i32, %arg1: i32, %arg2: memref<32x64xbf16, #tpu.memory_space<vmem>>, %arg3: memref<64x64xbf16, #tpu.memory_space<vmem>>, %arg4: memref<1x64xf32, #tpu.memory_space<vmem>>, %arg5: memref<32x64xbf16, #tpu.memory_space<vmem>>, %arg6: memref<1x64xf32, #tpu.memory_space<vmem>>, %arg7: memref<1x64xf32, #tpu.memory_space<vmem>>, %arg8: memref<32x64xbf16, #tpu.memory_space<vmem>>) attributes {dimension_semantics = [#tpu.dimension_semantics<parallel>, #tpu.dimension_semantics<parallel>], iteration_bounds = array<i64: 1, 1>, scalar_prefetch = 0 : i64, scratch_operands = 0 : i64, tpu.core_type = #tpu.core_type<tc>, window_params = [{transform_indices = @transform_0, window_bounds = array<i64: 32, 64>}, {transform_indices = @transform_1, window_bounds = array<i64: 64, 64>}, {transform_indices = @transform_2, window_bounds = array<i64: 1, 64>}, {transform_indices = @transform_3, window_bounds = array<i64: 32, 64>}, {pipeline_mode = #tpu.pipeline_mode<synchronous>, transform_indices = @transform_4, window_bounds = array<i64: 1, 64>}, {pipeline_mode = #tpu.pipeline_mode<synchronous>, transform_indices = @transform_5, window_bounds = array<i64: 1, 64>}, {transform_indices = @transform_6, window_bounds = array<i64: 32, 64>}]} {
    %c0 = arith.constant 0 : index
    %c0_0 = arith.constant 0 : index
    %0 = vector.load %arg2[%c0, %c0_0] : memref<32x64xbf16, #tpu.memory_space<vmem>>, vector<32x64xbf16>
    %c0_1 = arith.constant 0 : index
    %c0_2 = arith.constant 0 : index
    %1 = vector.load %arg3[%c0_1, %c0_2] : memref<64x64xbf16, #tpu.memory_space<vmem>>, vector<64x64xbf16>
    %cst = arith.constant dense<0.000000e+00> : vector<32x64xf32>
    %2 = tpu.matmul %0, %1, %cst {dimension_numbers = #tpu.dot_dimension_numbers<[1], [0], [0], [1], [0, 0, 1, 1], [], []>} : vector<32x64xbf16>, vector<64x64xbf16>, vector<32x64xf32> -> vector<32x64xf32>
    %c0_3 = arith.constant 0 : index
    %c0_4 = arith.constant 0 : index
    %3 = vector.load %arg4[%c0_3, %c0_4] : memref<1x64xf32, #tpu.memory_space<vmem>>, vector<1x64xf32>
    %4 = vector.broadcast %3 : vector<1x64xf32> to vector<32x64xf32>
    %5 = arith.addf %2, %4 : vector<32x64xf32>
    %c0_5 = arith.constant 0 : index
    %c0_6 = arith.constant 0 : index
    %6 = vector.load %arg5[%c0_5, %c0_6] : memref<32x64xbf16, #tpu.memory_space<vmem>>, vector<32x64xbf16>
    %7 = arith.extf %6 : vector<32x64xbf16> to vector<32x64xf32>
    %8 = arith.addf %5, %7 : vector<32x64xf32>
    %cst_7 = arith.constant dense<0.000000e+00> : vector<32xf32>
    %9 = vector.multi_reduction <add>, %8, %cst_7 [1] : vector<32x64xf32> to vector<32xf32>
    %10 = vector.shape_cast %9 : vector<32xf32> to vector<32x1xf32>
    %cst_8 = arith.constant 6.400000e+01 : f32
    %11 = vector.broadcast %cst_8 : f32 to vector<32x1xf32>
    %12 = arith.divf %10, %11 : vector<32x1xf32>
    %13 = vector.broadcast %12 : vector<32x1xf32> to vector<32x64xf32>
    %14 = arith.subf %8, %13 : vector<32x64xf32>
    %15 = arith.mulf %14, %14 : vector<32x64xf32>
    %cst_9 = arith.constant dense<0.000000e+00> : vector<32xf32>
    %16 = vector.multi_reduction <add>, %15, %cst_9 [1] : vector<32x64xf32> to vector<32xf32>
    %17 = vector.shape_cast %16 : vector<32xf32> to vector<32x1xf32>
    %cst_10 = arith.constant 6.400000e+01 : f32
    %18 = vector.broadcast %cst_10 : f32 to vector<32x1xf32>
    %19 = arith.divf %17, %18 : vector<32x1xf32>
    %20 = vector.broadcast %12 : vector<32x1xf32> to vector<32x64xf32>
    %21 = arith.subf %8, %20 : vector<32x64xf32>
    %cst_11 = arith.constant 9.99999996E-13 : f32
    %22 = vector.broadcast %cst_11 : f32 to vector<32x1xf32>
    %23 = arith.addf %19, %22 : vector<32x1xf32>
    %24 = math.rsqrt %23 : vector<32x1xf32>
    %25 = vector.broadcast %24 : vector<32x1xf32> to vector<32x64xf32>
    %26 = arith.mulf %21, %25 : vector<32x64xf32>
    %c0_12 = arith.constant 0 : index
    %c0_13 = arith.constant 0 : index
    %27 = vector.load %arg6[%c0_12, %c0_13] : memref<1x64xf32, #tpu.memory_space<vmem>>, vector<1x64xf32>
    %28 = vector.broadcast %27 : vector<1x64xf32> to vector<32x64xf32>
    %29 = arith.mulf %26, %28 : vector<32x64xf32>
    %c0_14 = arith.constant 0 : index
    %c0_15 = arith.constant 0 : index
    %30 = vector.load %arg7[%c0_14, %c0_15] : memref<1x64xf32, #tpu.memory_space<vmem>>, vector<1x64xf32>
    %31 = vector.broadcast %30 : vector<1x64xf32> to vector<32x64xf32>
    %32 = arith.addf %29, %31 : vector<32x64xf32>
    %33 = arith.truncf %32 : vector<32x64xf32> to vector<32x64xbf16>
    %c0_16 = arith.constant 0 : index
    %c0_17 = arith.constant 0 : index
    %34 = vector.load %arg8[%c0_16, %c0_17] : memref<32x64xbf16, #tpu.memory_space<vmem>>, vector<32x64xbf16>
    tpu.vector_store %arg8[%c0_16, %c0_17], %33 {strides = array<i32>} : memref<32x64xbf16, #tpu.memory_space<vmem>>, vector<32x64xbf16>,
    return
  }
  func.func @transform_0(%arg0: i32, %arg1: i32) -> (i32, i32) {
    %c0_i32 = arith.constant 0 : i32
    %c0_i32_0 = arith.constant 0 : i32
    return %arg1, %c0_i32 : i32, i32
  }
  func.func @transform_1(%arg0: i32, %arg1: i32) -> (i32, i32) {
    %c0_i32 = arith.constant 0 : i32
    %c0_i32_0 = arith.constant 0 : i32
    return %c0_i32, %arg0 : i32, i32
  }
  func.func @transform_2(%arg0: i32, %arg1: i32) -> (i32, i32) {
    %c0_i32 = arith.constant 0 : i32
    %c0_i32_0 = arith.constant 0 : i32
    return %c0_i32, %arg0 : i32, i32
  }
  func.func @transform_3(%arg0: i32, %arg1: i32) -> (i32, i32) {
    %c0_i32 = arith.constant 0 : i32
    %c0_i32_0 = arith.constant 0 : i32
    return %arg1, %c0_i32 : i32, i32
  }
  func.func @transform_4(%arg0: i32, %arg1: i32) -> (i32, i32) {
    %c0_i32 = arith.constant 0 : i32
    %c0_i32_0 = arith.constant 0 : i32
    %c0_i32_1 = arith.constant 0 : i32
    return %c0_i32, %c0_i32_0 : i32, i32
  }
  func.func @transform_5(%arg0: i32, %arg1: i32) -> (i32, i32) {
    %c0_i32 = arith.constant 0 : i32
    %c0_i32_0 = arith.constant 0 : i32
    %c0_i32_1 = arith.constant 0 : i32
    return %c0_i32, %c0_i32_0 : i32, i32
  }
  func.func @transform_6(%arg0: i32, %arg1: i32) -> (i32, i32) {
    %c0_i32 = arith.constant 0 : i32
    return %arg1, %arg0 : i32, i32
  }
}

module attributes {stable_mosaic.version = 11 : i64} {
  func.func @_linear_fused_kernel(%arg0: i32, %arg1: i32, %arg2: memref<32x64xbf16, #tpu.memory_space<vmem>>, %arg3: memref<64x256xbf16, #tpu.memory_space<vmem>>, %arg4: memref<1x256xf32, #tpu.memory_space<vmem>>, %arg5: memref<32x256xbf16, #tpu.memory_space<vmem>>) attributes {dimension_semantics = [#tpu.dimension_semantics<parallel>, #tpu.dimension_semantics<parallel>], iteration_bounds = array<i64: 1, 1>, scalar_prefetch = 0 : i64, scratch_operands = 0 : i64, tpu.core_type = #tpu.core_type<tc>, window_params = [{transform_indices = @transform_0, window_bounds = array<i64: 32, 64>}, {transform_indices = @transform_1, window_bounds = array<i64: 64, 256>}, {transform_indices = @transform_2, window_bounds = array<i64: 1, 256>}, {transform_indices = @transform_3, window_bounds = array<i64: 32, 256>}]} {
    %c0 = arith.constant 0 : index
    %c0_0 = arith.constant 0 : index
    %0 = vector.load %arg2[%c0, %c0_0] : memref<32x64xbf16, #tpu.memory_space<vmem>>, vector<32x64xbf16>
    %c0_1 = arith.constant 0 : index
    %c0_2 = arith.constant 0 : index
    %1 = vector.load %arg3[%c0_1, %c0_2] : memref<64x256xbf16, #tpu.memory_space<vmem>>, vector<64x256xbf16>
    %cst = arith.constant dense<0.000000e+00> : vector<32x256xf32>
    %2 = tpu.matmul %0, %1, %cst {dimension_numbers = #tpu.dot_dimension_numbers<[1], [0], [0], [1], [0, 0, 1, 1], [], []>} : vector<32x64xbf16>, vector<64x256xbf16>, vector<32x256xf32> -> vector<32x256xf32>
    %c0_3 = arith.constant 0 : index
    %c0_4 = arith.constant 0 : index
    %3 = vector.load %arg4[%c0_3, %c0_4] : memref<1x256xf32, #tpu.memory_space<vmem>>, vector<1x256xf32>
    %4 = vector.broadcast %3 : vector<1x256xf32> to vector<32x256xf32>
    %5 = arith.addf %2, %4 : vector<32x256xf32>
    %cst_5 = arith.constant 5.000000e-01 : f32
    %6 = vector.broadcast %cst_5 : f32 to vector<32x256xf32>
    %7 = arith.mulf %6, %5 : vector<32x256xf32>
    %cst_6 = arith.constant 0.707106769 : f32
    %8 = vector.broadcast %cst_6 : f32 to vector<32x256xf32>
    %9 = arith.mulf %5, %8 : vector<32x256xf32>
    %10 = math.erf %9 : vector<32x256xf32>
    %cst_7 = arith.constant 1.000000e+00 : f32
    %11 = vector.broadcast %cst_7 : f32 to vector<32x256xf32>
    %12 = arith.addf %11, %10 : vector<32x256xf32>
    %13 = arith.mulf %7, %12 : vector<32x256xf32>
    %14 = arith.truncf %13 : vector<32x256xf32> to vector<32x256xbf16>
    %c0_8 = arith.constant 0 : index
    %c0_9 = arith.constant 0 : index
    %15 = vector.load %arg5[%c0_8, %c0_9] : memref<32x256xbf16, #tpu.memory_space<vmem>>, vector<32x256xbf16>
    tpu.vector_store %arg5[%c0_8, %c0_9], %14 {strides = array<i32>} : memref<32x256xbf16, #tpu.memory_space<vmem>>, vector<32x256xbf16>,
    return
  }
  func.func @transform_0(%arg0: i32, %arg1: i32) -> (i32, i32) {
    %c0_i32 = arith.constant 0 : i32
    %c0_i32_0 = arith.constant 0 : i32
    return %arg1, %c0_i32 : i32, i32
  }
  func.func @transform_1(%arg0: i32, %arg1: i32) -> (i32, i32) {
    %c0_i32 = arith.constant 0 : i32
    %c0_i32_0 = arith.constant 0 : i32
    return %c0_i32, %arg0 : i32, i32
  }
  func.func @transform_2(%arg0: i32, %arg1: i32) -> (i32, i32) {
    %c0_i32 = arith.constant 0 : i32
    %c0_i32_0 = arith.constant 0 : i32
    return %c0_i32, %arg0 : i32, i32
  }
  func.func @transform_3(%arg0: i32, %arg1: i32) -> (i32, i32) {
    %c0_i32 = arith.constant 0 : i32
    return %arg1, %arg0 : i32, i32
  }
}

module attributes {stable_mosaic.version = 11 : i64} {
  func.func @_linear_ln_fused_kernel(%arg0: i32, %arg1: i32, %arg2: memref<32x256xbf16, #tpu.memory_space<vmem>>, %arg3: memref<256x64xbf16, #tpu.memory_space<vmem>>, %arg4: memref<1x64xf32, #tpu.memory_space<vmem>>, %arg5: memref<32x64xbf16, #tpu.memory_space<vmem>>, %arg6: memref<1x64xf32, #tpu.memory_space<vmem>>, %arg7: memref<1x64xf32, #tpu.memory_space<vmem>>, %arg8: memref<32x64xbf16, #tpu.memory_space<vmem>>) attributes {dimension_semantics = [#tpu.dimension_semantics<parallel>, #tpu.dimension_semantics<parallel>], iteration_bounds = array<i64: 1, 1>, scalar_prefetch = 0 : i64, scratch_operands = 0 : i64, tpu.core_type = #tpu.core_type<tc>, window_params = [{transform_indices = @transform_0, window_bounds = array<i64: 32, 256>}, {transform_indices = @transform_1, window_bounds = array<i64: 256, 64>}, {transform_indices = @transform_2, window_bounds = array<i64: 1, 64>}, {transform_indices = @transform_3, window_bounds = array<i64: 32, 64>}, {pipeline_mode = #tpu.pipeline_mode<synchronous>, transform_indices = @transform_4, window_bounds = array<i64: 1, 64>}, {pipeline_mode = #tpu.pipeline_mode<synchronous>, transform_indices = @transform_5, window_bounds = array<i64: 1, 64>}, {transform_indices = @transform_6, window_bounds = array<i64: 32, 64>}]} {
    %c0 = arith.constant 0 : index
    %c0_0 = arith.constant 0 : index
    %0 = vector.load %arg2[%c0, %c0_0] : memref<32x256xbf16, #tpu.memory_space<vmem>>, vector<32x256xbf16>
    %c0_1 = arith.constant 0 : index
    %c0_2 = arith.constant 0 : index
    %1 = vector.load %arg3[%c0_1, %c0_2] : memref<256x64xbf16, #tpu.memory_space<vmem>>, vector<256x64xbf16>
    %cst = arith.constant dense<0.000000e+00> : vector<32x64xf32>
    %2 = tpu.matmul %0, %1, %cst {dimension_numbers = #tpu.dot_dimension_numbers<[1], [0], [0], [1], [0, 0, 1, 1], [], []>} : vector<32x256xbf16>, vector<256x64xbf16>, vector<32x64xf32> -> vector<32x64xf32>
    %c0_3 = arith.constant 0 : index
    %c0_4 = arith.constant 0 : index
    %3 = vector.load %arg4[%c0_3, %c0_4] : memref<1x64xf32, #tpu.memory_space<vmem>>, vector<1x64xf32>
    %4 = vector.broadcast %3 : vector<1x64xf32> to vector<32x64xf32>
    %5 = arith.addf %2, %4 : vector<32x64xf32>
    %c0_5 = arith.constant 0 : index
    %c0_6 = arith.constant 0 : index
    %6 = vector.load %arg5[%c0_5, %c0_6] : memref<32x64xbf16, #tpu.memory_space<vmem>>, vector<32x64xbf16>
    %7 = arith.extf %6 : vector<32x64xbf16> to vector<32x64xf32>
    %8 = arith.addf %5, %7 : vector<32x64xf32>
    %cst_7 = arith.constant dense<0.000000e+00> : vector<32xf32>
    %9 = vector.multi_reduction <add>, %8, %cst_7 [1] : vector<32x64xf32> to vector<32xf32>
    %10 = vector.shape_cast %9 : vector<32xf32> to vector<32x1xf32>
    %cst_8 = arith.constant 6.400000e+01 : f32
    %11 = vector.broadcast %cst_8 : f32 to vector<32x1xf32>
    %12 = arith.divf %10, %11 : vector<32x1xf32>
    %13 = vector.broadcast %12 : vector<32x1xf32> to vector<32x64xf32>
    %14 = arith.subf %8, %13 : vector<32x64xf32>
    %15 = arith.mulf %14, %14 : vector<32x64xf32>
    %cst_9 = arith.constant dense<0.000000e+00> : vector<32xf32>
    %16 = vector.multi_reduction <add>, %15, %cst_9 [1] : vector<32x64xf32> to vector<32xf32>
    %17 = vector.shape_cast %16 : vector<32xf32> to vector<32x1xf32>
    %cst_10 = arith.constant 6.400000e+01 : f32
    %18 = vector.broadcast %cst_10 : f32 to vector<32x1xf32>
    %19 = arith.divf %17, %18 : vector<32x1xf32>
    %20 = vector.broadcast %12 : vector<32x1xf32> to vector<32x64xf32>
    %21 = arith.subf %8, %20 : vector<32x64xf32>
    %cst_11 = arith.constant 9.99999996E-13 : f32
    %22 = vector.broadcast %cst_11 : f32 to vector<32x1xf32>
    %23 = arith.addf %19, %22 : vector<32x1xf32>
    %24 = math.rsqrt %23 : vector<32x1xf32>
    %25 = vector.broadcast %24 : vector<32x1xf32> to vector<32x64xf32>
    %26 = arith.mulf %21, %25 : vector<32x64xf32>
    %c0_12 = arith.constant 0 : index
    %c0_13 = arith.constant 0 : index
    %27 = vector.load %arg6[%c0_12, %c0_13] : memref<1x64xf32, #tpu.memory_space<vmem>>, vector<1x64xf32>
    %28 = vector.broadcast %27 : vector<1x64xf32> to vector<32x64xf32>
    %29 = arith.mulf %26, %28 : vector<32x64xf32>
    %c0_14 = arith.constant 0 : index
    %c0_15 = arith.constant 0 : index
    %30 = vector.load %arg7[%c0_14, %c0_15] : memref<1x64xf32, #tpu.memory_space<vmem>>, vector<1x64xf32>
    %31 = vector.broadcast %30 : vector<1x64xf32> to vector<32x64xf32>
    %32 = arith.addf %29, %31 : vector<32x64xf32>
    %33 = arith.truncf %32 : vector<32x64xf32> to vector<32x64xbf16>
    %c0_16 = arith.constant 0 : index
    %c0_17 = arith.constant 0 : index
    %34 = vector.load %arg8[%c0_16, %c0_17] : memref<32x64xbf16, #tpu.memory_space<vmem>>, vector<32x64xbf16>
    tpu.vector_store %arg8[%c0_16, %c0_17], %33 {strides = array<i32>} : memref<32x64xbf16, #tpu.memory_space<vmem>>, vector<32x64xbf16>,
    return
  }
  func.func @transform_0(%arg0: i32, %arg1: i32) -> (i32, i32) {
    %c0_i32 = arith.constant 0 : i32
    %c0_i32_0 = arith.constant 0 : i32
    return %arg1, %c0_i32 : i32, i32
  }
  func.func @transform_1(%arg0: i32, %arg1: i32) -> (i32, i32) {
    %c0_i32 = arith.constant 0 : i32
    %c0_i32_0 = arith.constant 0 : i32
    return %c0_i32, %arg0 : i32, i32
  }
  func.func @transform_2(%arg0: i32, %arg1: i32) -> (i32, i32) {
    %c0_i32 = arith.constant 0 : i32
    %c0_i32_0 = arith.constant 0 : i32
    return %c0_i32, %arg0 : i32, i32
  }
  func.func @transform_3(%arg0: i32, %arg1: i32) -> (i32, i32) {
    %c0_i32 = arith.constant 0 : i32
    %c0_i32_0 = arith.constant 0 : i32
    return %arg1, %c0_i32 : i32, i32
  }
  func.func @transform_4(%arg0: i32, %arg1: i32) -> (i32, i32) {
    %c0_i32 = arith.constant 0 : i32
    %c0_i32_0 = arith.constant 0 : i32
    %c0_i32_1 = arith.constant 0 : i32
    return %c0_i32, %c0_i32_0 : i32, i32
  }
  func.func @transform_5(%arg0: i32, %arg1: i32) -> (i32, i32) {
    %c0_i32 = arith.constant 0 : i32
    %c0_i32_0 = arith.constant 0 : i32
    %c0_i32_1 = arith.constant 0 : i32
    return %c0_i32, %c0_i32_0 : i32, i32
  }
  func.func @transform_6(%arg0: i32, %arg1: i32) -> (i32, i32) {
    %c0_i32 = arith.constant 0 : i32
    return %arg1, %arg0 : i32, i32
  }
}

</mosaic_0001>

<bundles_post_ra>
// kernel: bert_encoder_forward.13
= control target key start
LH: loop header
LB: loop body
LE: loop exit
PB: predicated region body
PF: predicated region fallthrough
CT: control target
= control target key end

     0   :  { %v280_v1 = vmov 0   ;;  %vm89_vm0 = vcmask 523264   ;;  %v29_v11 = vlaneseq  ;;  %s346_s1 = inlined_call_operand.vmem [shape: bf16[64,256], index: 1, kind: input, shape index: {}]   ;;  %s347_s0 = inlined_call_operand.vmem [shape: bf16[32,64], index: 0, kind: input, shape index: {}]   ;;  %s348_s2 = inlined_call_operand.vmem [shape: f32[1,256], index: 2, kind: input, shape index: {}]   ;;  %s349_s3 = inlined_call_operand.vmem [shape: bf16[32,256], index: 3, kind: output, shape index: {}]  }
   0x1   :  { %v250_v0 = vld [vmem:[%s346_s1 + $0x4] ss:$8 sps:$4 sm:$0xff]   ;;  %128 = vmatprep.mubr.bf16.mxu0 %v280_v1  ;;  %138 = vmatprep.mubr.bf16.mxu1 %v280_v1  ;;  %v252_v2 = vld [vmem:[%s346_s1] ss:$8 sps:$4 sm:$0xff]   ;;  %v253_v3 = vld [vmem:[%s346_s1 + $0x14] ss:$8 sps:$4 sm:$0xff]  }
   0x2   :  { %96 = vmatprep.subr.bf16.mxu0 %v250_v0  ;;  %241 = vmatprep.subr.bf16.mxu1 %v250_v0  ;;  %v255_v4 = vld [vmem:[%s346_s1 + $0x10] ss:$8 sps:$4 sm:$0xff]   ;;  %v256_v5 = vld [vmem:[%s346_s1 + $0x24] ss:$8 sps:$4 sm:$0xff]   ;;  %v258_v6 = vld [vmem:[%s346_s1 + $0x20] ss:$8 sps:$4 sm:$0xff]  }
   0x3   :  { %97 = vmatpush1.bf16.msra.mxu0 %v252_v2  ;;  %245 = vmatpush1.bf16.msra.mxu1 %v252_v2  ;;  %v259_v7 = vld [vmem:[%s346_s1 + $0x34] ss:$8 sps:$4 sm:$0xff]   ;;  %v261_v8 = vld [vmem:[%s346_s1 + $0x30] ss:$8 sps:$4 sm:$0xff]   ;;  %v262_v9 = vld [vmem:[%s347_s0] sm:$0xff]   ;;  %v30_v12 = vshrl.u32 %v29_v11, 7 }
   0x4   :  { %98 = vmatprep.subr.bf16.mxu0 %v253_v3  ;;  %242 = vmatprep.subr.bf16.mxu1 %v253_v3  ;;  %v263_v10 = vld [vmem:[%s347_s0 + $0x8] sm:$0xff]   ;;  %v27_v14 = vld [vmem:[%s348_s2] sm:$0x3] }
   0x5   :  { %v31_v13 = vsub.s32 0, %v30_v12  ;;  %v35_v15 = vsub.s32 1, %v30_v12 }
   0x7   :  { %99 = vmatpush1.bf16.msra.mxu0 %v255_v4  ;;  %246 = vmatpush1.bf16.msra.mxu1 %v255_v4  ;;  %v32_v16 = vrot.slane %v27_v14, %v31_v13  ;;  %v36_v17 = vrot.slane %v27_v14, %v35_v15 }
   0x8   :  { %100 = vmatprep.subr.bf16.mxu0 %v256_v5  ;;  %243 = vmatprep.subr.bf16.mxu1 %v256_v5 }
   0xb   :  { %101 = vmatpush1.bf16.msra.mxu0 %v258_v6  ;;  %247 = vmatpush1.bf16.msra.mxu1 %v258_v6 }
   0xc   :  { %102 = vmatprep.subr.bf16.mxu0 %v259_v7  ;;  %244 = vmatprep.subr.bf16.mxu1 %v259_v7 }
   0xf   :  { %103 = vmatpush1.bf16.msra.mxu0 %v261_v8  ;;  %248 = vmatpush1.bf16.msra.mxu1 %v261_v8 }
  0x12   :  { %231 = vmatmul.mubr.msk.bf16.vlgmr.msra.gmra.mrb[0].mxu0 %vm89_vm0, %v262_v9  ;;  %232 = vmatmul.mubr.msk.bf16.vlgmr.msra.gmra.mrb[0].mxu1 %vm89_vm0, %v263_v10 }
  0xe5   :  { %v130_v18 = vpop.f32.mrb[0].mxu0  ;;  %v140_v19 = vpop.f32.mrb[0].mxu1 }
  0xe6   :  { %v131_v20 = vadd.f32 %v130_v18, %v32_v16  ;;  %v141_v21 = vadd.f32 %v140_v19, %v32_v16  ;;  %v132_v22 = vpop.f32.mrb[1].mxu0  ;;  %v142_v23 = vpop.f32.mrb[1].mxu1 }
  0xe7   :  { %v133_v24 = vadd.f32 %v132_v22, %v36_v17  ;;  %v143_v25 = vadd.f32 %v142_v23, %v36_v17  ;;  %v134_v26 = vpop.f32.mrb[2].mxu0  ;;  %v144_v27 = vpop.f32.mrb[2].mxu1 }
  0xe8   :  { %v157_v28 = vmul.f32 0.70710677, %v131_v20  ;;  %v161_v29 = vmul.f32 0.70710677, %v141_v21  ;;  %v135_v32 = vadd.f32 %v134_v26, %v32_v16  ;;  %v145_v33 = vadd.f32 %v144_v27, %v32_v16  ;;  %v136_v34 = vpop.f32.mrb[3].mxu0  ;;  %v146_v35 = vpop.f32.mrb[3].mxu1 }
  0xe9   :  { %v158_v30 = vmul.f32 0.70710677, %v133_v24  ;;  %v162_v31 = vmul.f32 0.70710677, %v143_v25  ;;  %v137_v36 = vadd.f32 %v136_v34, %v36_v17  ;;  %v147_v37 = vadd.f32 %v146_v35, %v36_v17 }
  0xea   :  { %264 = verf.f32 %v157_v28  ;;  %v159_v38 = vmul.f32 0.70710677, %v135_v32  ;;  %v163_v39 = vmul.f32 0.70710677, %v145_v33  ;;  %v149_v44 = vmul.f32 0.5, %v131_v20 }
  0xeb   :  { %266 = verf.f32 %v161_v29  ;;  %v160_v40 = vmul.f32 0.70710677, %v137_v36  ;;  %v164_v41 = vmul.f32 0.70710677, %v147_v37  ;;  %v153_v47 = vmul.f32 0.5, %v141_v21 }
  0xec   :  { %268 = verf.f32 %v158_v30  ;;  %v150_v51 = vmul.f32 0.5, %v133_v24  ;;  %v154_v55 = vmul.f32 0.5, %v143_v25  ;;  %v151_v59 = vmul.f32 0.5, %v135_v32 }
  0xed   :  { %270 = verf.f32 %v162_v31  ;;  %v155_v63 = vmul.f32 0.5, %v145_v33  ;;  %v152_v4 = vmul.f32 0.5, %v137_v36  ;;  %v156_v8 = vmul.f32 0.5, %v147_v37 }
  0xee   :  { %272 = verf.f32 %v159_v38 }
  0xef   :  { %274 = verf.f32 %v163_v39 }
  0xf0   :  { %276 = verf.f32 %v160_v40 }
  0xf1   :  { %278 = verf.f32 %v164_v41 }
  0xf4   :  { %v265_v42 = vpop.eup %264 }
  0xf5   :  { %v267_v43 = vpop.eup %266  ;;  %v173_v45 = vadd.f32 1.0, %v265_v42 }
  0xf6   :  { %v269_v46 = vpop.eup %268  ;;  %v177_v48 = vadd.f32 1.0, %v267_v43 }
  0xf7   :  { %v271_v49 = vpop.eup %270  ;;  %v181_v50 = vmul.f32 %v173_v45, %v149_v44  ;;  %v174_v52 = vadd.f32 1.0, %v269_v46 }
  0xf8   :  { %v273_v53 = vpop.eup %272  ;;  %v185_v54 = vmul.f32 %v177_v48, %v153_v47  ;;  %v178_v56 = vadd.f32 1.0, %v271_v49 }
  0xf9   :  { %v275_v57 = vpop.eup %274  ;;  %v182_v58 = vmul.f32 %v174_v52, %v150_v51  ;;  %v175_v60 = vadd.f32 1.0, %v273_v53 }
  0xfa   :  { %v277_v61 = vpop.eup %276  ;;  %v186_v62 = vmul.f32 %v178_v56, %v154_v55  ;;  %v179_v0 = vadd.f32 1.0, %v275_v57 }
  0xfb   :  { %v279_v1 = vpop.eup %278  ;;  %v237_v2 = vpack.c.bf16 %v182_v58, %v181_v50  ;;  %v183_v3 = vmul.f32 %v175_v60, %v151_v59  ;;  %v176_v5 = vadd.f32 1.0, %v277_v61 }
  0xfc   :  { %v239_v6 = vpack.c.bf16 %v186_v62, %v185_v54  ;;  %v187_v7 = vmul.f32 %v179_v0, %v155_v63  ;;  %v180_v9 = vadd.f32 1.0, %v279_v1 }
  0xfd   :  { %213 = vst [vmem:[%s349_s3] sm:$0xff] %v237_v2  ;;  %v184_v10 = vmul.f32 %v176_v5, %v152_v4 }
  0xfe   :  { %215 = vst [vmem:[%s349_s3 + $0x10] sm:$0xff] %v239_v6  ;;  %v188_v11 = vmul.f32 %v180_v9, %v156_v8 }
  0xff   :  { %v238_v12 = vpack.c.bf16 %v184_v10, %v183_v3 }
 0x100   :  { %v240_v13 = vpack.c.bf16 %v188_v11, %v187_v7 }
 0x101   :  { %214 = vst [vmem:[%s349_s3 + $0x8] sm:$0xff] %v238_v12 }
 0x102   :  { %216 = vst [vmem:[%s349_s3 + $0x18] sm:$0xff] %v240_v13 }

// kernel: bert_encoder_forward.12
= control target key start
LH: loop header
LB: loop body
LE: loop exit
PB: predicated region body
PF: predicated region fallthrough
CT: control target
= control target key end

     0   :  { %vm77_vm0 = vcmask 523264   ;;  %vm236_vm1 = vcmask 519168   ;;  %s399_s1 = inlined_call_operand.vmem [shape: bf16[64,64], index: 1, kind: input, shape index: {}]   ;;  %s400_s0 = inlined_call_operand.vmem [shape: bf16[32,64], index: 0, kind: input, shape index: {}]   ;;  %s401_s3 = inlined_call_operand.vmem [shape: bf16[32,64], index: 3, kind: input, shape index: {}]   ;;  %s402_s2 = inlined_call_operand.vmem [shape: f32[1,64], index: 2, kind: input, shape index: {}, may-alias: {2,5}]   ;;  %s403_s4 = inlined_call_operand.vmem [shape: f32[1,64], index: 4, kind: input, shape index: {}]   ;;  %s404_s5 = inlined_call_operand.vmem [shape: f32[1,64], index: 5, kind: input, shape index: {}, may-alias: {2,5}]   ;;  %s405_s6 = inlined_call_operand.vmem [shape: bf16[32,64], index: 6, kind: output, shape index: {}]  }
   0x1   :  { %v291_v0 = vld [vmem:[%s399_s1] sm:$0xff]   ;;  %v292_v1 = vld [vmem:[%s399_s1 + $0x8] sm:$0xff]   ;;  %v293_v2 = vld [vmem:[%s399_s1 + $0x10] sm:$0xff]  }
   0x2   :  { %279 = vmatprep.subr.bf16.mxu0 %v291_v0  ;;  %v295_v3 = vld [vmem:[%s400_s0] sm:$0xff]   ;;  %v294_v4 = vld [vmem:[%s399_s1 + $0x18] sm:$0xff]   ;;  %v296_v5 = vld [vmem:[%s400_s0 + $0x8] sm:$0xff]  }
   0x3   :  { %280 = vmatpush3.bf16.msra.mxu0 %v291_v0  ;;  %287 = vmatprep.mubr.msk.bf16.mxu0 %vm77_vm0, %v295_v3  ;;  %v272_v6 = vld [vmem:[%s401_s3 + $0x8] sm:$0xff]   ;;  %v265_v7 = vld [vmem:[%s401_s3] sm:$0xff]  }
   0x4   :  { %281 = vmatprep.subr.bf16.mxu0 %v292_v1  ;;  %v245_v8 = vld [vmem:[%s402_s2] ss:$0 sm:$0xff]  ;;  %v270_v9 = vunpack.c.l.bf16 %v272_v6  ;;  %v266_v11 = vunpack.c.l.bf16 %v265_v7  ;;  %v271_v14 = vunpack.c.h.bf16 %v272_v6  ;;  %v267_v17 = vunpack.c.h.bf16 %v265_v7 }
   0x5   :  { %v254_v62 = vld [vmem:[%s403_s4] ss:$0 sm:$0xff] }
   0x6   :  { %v255_v0 = vld [vmem:[%s404_s5] ss:$0 sm:$0xff] }
   0x7   :  { %282 = vmatpush3.bf16.msra.mxu0 %v292_v1 }
   0x8   :  { %283 = vmatprep.subr.bf16.mxu0 %v293_v2 }
   0xb   :  { %284 = vmatpush3.bf16.msra.mxu0 %v293_v2 }
   0xc   :  { %285 = vmatprep.subr.bf16.mxu0 %v294_v4 }
   0xf   :  { %286 = vmatpush3.bf16.msra.mxu0 %v294_v4 }
  0x12   :  { %288 = vmatmul.mubr.msk.bf16.vlgmr.msra.gmra.mrb[0].mxu0 %vm77_vm0, %v296_v5 }
  0xe5   :  { %v289_v10 = vpop.f32.mrb[0].mxu0 }
  0xe6   :  { %v127_v12 = vadd.f32 %v289_v10, %v245_v8  ;;  %v118_v13 = vpop.f32.mrb[1].mxu0 }
  0xe7   :  { %v119_v15 = vadd.f32 %v245_v8, %v118_v13  ;;  %v290_v16 = vpop.f32.mrb[2].mxu0 }
  0xe8   :  { %v130_v18 = vadd.f32 %v290_v16, %v245_v8  ;;  %v121_v19 = vpop.f32.mrb[3].mxu0  ;;  %v143_v20 = vadd.f32 %v270_v9, %v127_v12 }
  0xe9   :  { %v122_v21 = vadd.f32 %v245_v8, %v121_v19  ;;  %v141_v22 = vadd.f32 %v266_v11, %v119_v15 }
  0xea   :  { %v151_v23 = vsel %vm77_vm0, %v143_v20, 0.0  ;;  %v144_v24 = vadd.f32 %v271_v14, %v130_v18 }
  0xeb   :  { %152 = vadd.xlane.f32.xlu1 %v151_v23  ;;  %v145_v25 = vsel %vm77_vm0, %v141_v22, 0.0  ;;  %v142_v26 = vadd.f32 %v267_v17, %v122_v21 }
  0xec   :  { %146 = vadd.xlane.f32.xlu0 %v145_v25  ;;  %v154_v27 = vsel %vm77_vm0, %v144_v24, 0.0 }
  0xed   :  { %v148_v28 = vsel %vm77_vm0, %v142_v26, 0.0 }
  0xef   :  { %155 = vadd.xlane.f32.xlu1 %v154_v27 }
  0xf0   :  { %149 = vadd.xlane.f32.xlu0 %v148_v28 }
 0x178   :  { %v153_v29 = vpop.xlane.xlu1 %152 }
 0x179   :  { %v160_v30 = vmul.f32 0.015625, %v153_v29  ;;  %v147_v31 = vpop.xlane.xlu0 %146 }
 0x17a   :  { %v158_v32 = vmul.f32 0.015625, %v147_v31 }
 0x17b   :  { %v164_v33 = vsub.f32 %v143_v20, %v160_v30 }
 0x17c   :  { %v162_v34 = vsub.f32 %v141_v22, %v158_v32  ;;  %v156_v35 = vpop.xlane.xlu1 %155 }
 0x17d   :  { %v161_v36 = vmul.f32 0.015625, %v156_v35  ;;  %v150_v37 = vpop.xlane.xlu0 %149  ;;  %v168_v43 = vmul.f32 %v164_v33, %v164_v33 }
 0x17e   :  { %v159_v38 = vmul.f32 0.015625, %v150_v37  ;;  %v166_v39 = vmul.f32 %v162_v34, %v162_v34 }
 0x17f   :  { %v165_v40 = vsub.f32 %v144_v24, %v161_v36  ;;  %v176_v45 = vsel %vm77_vm0, %v168_v43, 0.0 }
 0x180   :  { %v163_v41 = vsub.f32 %v142_v26, %v159_v38  ;;  %v170_v42 = vsel %vm77_vm0, %v166_v39, 0.0 }
 0x181   :  { %171 = vadd.xlane.f32.xlu0 %v170_v42  ;;  %v169_v47 = vmul.f32 %v165_v40, %v165_v40 }
 0x182   :  { %v167_v44 = vmul.f32 %v163_v41, %v163_v41 }
 0x183   :  { %v179_v48 = vsel %vm77_vm0, %v169_v47, 0.0 }
 0x184   :  { %v173_v46 = vsel %vm77_vm0, %v167_v44, 0.0 }
 0x185   :  { %177 = vadd.xlane.f32.xlu0 %v176_v45  ;;  %174 = vadd.xlane.f32.xlu1 %v173_v46 }
 0x189   :  { %180 = vadd.xlane.f32.xlu1 %v179_v48 }
 0x20e   :  { %v172_v49 = vpop.xlane.xlu0 %171 }
 0x20f   :  { %v182_v50 = vmul.f32 0.015625, %v172_v49 }
 0x211   :  { %v186_v51 = vadd.f32 1e-12, %v182_v50 }
 0x212   :  { %v175_v52 = vpop.xlane.xlu1 %174  ;;  %v178_v53 = vpop.xlane.xlu0 %177 }
 0x213   :  { %297 = vrsqrt.f32 %v186_v51  ;;  %v183_v54 = vmul.f32 0.015625, %v175_v52  ;;  %v184_v55 = vmul.f32 0.015625, %v178_v53 }
 0x215   :  { %v187_v56 = vadd.f32 1e-12, %v183_v54  ;;  %v188_v57 = vadd.f32 1e-12, %v184_v55 }
 0x216   :  { %v181_v58 = vpop.xlane.xlu1 %180 }
 0x217   :  { %299 = vrsqrt.f32 %v187_v56  ;;  %v185_v59 = vmul.f32 0.015625, %v181_v58 }
 0x218   :  { %301 = vrsqrt.f32 %v188_v57 }
 0x219   :  { %v189_v60 = vadd.f32 1e-12, %v185_v59 }
 0x21b   :  { %303 = vrsqrt.f32 %v189_v60 }
 0x21d   :  { %v298_v61 = vpop.eup %297 }
 0x21e   :  { %v194_v63 = vmul.f32 %v298_v61, %v162_v34 }
 0x220   :  { %v205_v1 = vmul.f32 %v254_v62, %v194_v63 }
 0x221   :  { %v300_v2 = vpop.eup %299 }
 0x222   :  { %v302_v3 = vpop.eup %301  ;;  %v216_v4 = vadd.f32 %v255_v0, %v205_v1  ;;  %v195_v5 = vmul.f32 %v300_v2, %v163_v41 }
 0x223   :  { %v196_v6 = vmul.f32 %v302_v3, %v164_v33 }
 0x224   :  { %v260_v7 = vpack.c.bf16 %v216_v4, %v216_v4  ;;  %v206_v8 = vmul.f32 %v254_v62, %v195_v5 }
 0x225   :  { %v304_v9 = vpop.eup %303  ;;  %v207_v10 = vmul.f32 %v254_v62, %v196_v6 }
 0x226   :  { %237 = vst.msk [vmem:[%s405_s6] sm:$0xf] %vm236_vm1, %v260_v7  ;;  %v217_v11 = vadd.f32 %v255_v0, %v206_v8  ;;  %v197_v12 = vmul.f32 %v304_v9, %v165_v40 }
 0x227   :  { %v218_v13 = vadd.f32 %v255_v0, %v207_v10 }
 0x228   :  { %v261_v14 = vpack.c.bf16 %v217_v11, %v217_v11  ;;  %v208_v15 = vmul.f32 %v254_v62, %v197_v12 }
 0x229   :  { %v262_v16 = vpack.c.bf16 %v218_v13, %v218_v13 }
 0x22a   :  { %238 = vst.msk [vmem:[%s405_s6 + $0x4] sm:$0xf] %vm236_vm1, %v261_v14  ;;  %v219_v17 = vadd.f32 %v255_v0, %v208_v15 }
 0x22b   :  { %239 = vst.msk [vmem:[%s405_s6 + $0x8] sm:$0xf] %vm236_vm1, %v262_v16 }
 0x22c   :  { %v263_v18 = vpack.c.bf16 %v219_v17, %v219_v17 }
 0x22e   :  { %240 = vst.msk [vmem:[%s405_s6 + $0xc] sm:$0xf] %vm236_vm1, %v263_v18 }

// kernel: bert_encoder_forward.10
= control target key start
LH: loop header
LB: loop body
LE: loop exit
PB: predicated region body
PF: predicated region fallthrough
CT: control target
= control target key end

     0   :  { %v227_v1 = vmov 0   ;;  %vm89_vm0 = vcmask 523264   ;;  %v29_v11 = vlaneseq  ;;  %vm173_vm1 = vcmask 1043456   ;;  %s293_s1 = inlined_call_operand.vmem [shape: bf16[64,192], index: 1, kind: input, shape index: {}]   ;;  %s294_s0 = inlined_call_operand.vmem [shape: bf16[32,64], index: 0, kind: input, shape index: {}]   ;;  %s295_s2 = inlined_call_operand.vmem [shape: f32[1,192], index: 2, kind: input, shape index: {}]   ;;  %s296_s3 = inlined_call_operand.vmem [shape: bf16[32,192], index: 3, kind: output, shape index: {}]  }
   0x1   :  { %v213_v0 = vld [vmem:[%s293_s1 + $0x4] ss:$8 sps:$4 sm:$0xff]   ;;  %128 = vmatprep.mubr.bf16.mxu0 %v227_v1  ;;  %138 = vmatprep.mubr.bf16.mxu1 %v227_v1  ;;  %v215_v2 = vld [vmem:[%s293_s1] ss:$8 sps:$4 sm:$0xff]   ;;  %v216_v3 = vld [vmem:[%s293_s1 + $0x14] ss:$8 sps:$4 sm:$0xff]  }
   0x2   :  { %96 = vmatprep.subr.bf16.mxu0 %v213_v0  ;;  %204 = vmatprep.subr.bf16.mxu1 %v213_v0  ;;  %v218_v4 = vld [vmem:[%s293_s1 + $0x10] ss:$8 sps:$4 sm:$0xff]   ;;  %v219_v5 = vld [vmem:[%s293_s1 + $0x24] ss:$8 sps:$4 sm:$0xff]   ;;  %v221_v6 = vld [vmem:[%s293_s1 + $0x20] ss:$8 sps:$4 sm:$0xff]  }
   0x3   :  { %97 = vmatpush1.bf16.msra.mxu0 %v215_v2  ;;  %208 = vmatpush1.bf16.msra.mxu1 %v215_v2  ;;  %v222_v7 = vld [vmem:[%s293_s1 + $0x34] ss:$8 sps:$4 sm:$0xff]   ;;  %v224_v8 = vld [vmem:[%s293_s1 + $0x30] ss:$8 sps:$4 sm:$0xff]   ;;  %v225_v9 = vld [vmem:[%s294_s0] sm:$0xff]   ;;  %v30_v12 = vshrl.u32 %v29_v11, 7 }
   0x4   :  { %98 = vmatprep.subr.bf16.mxu0 %v216_v3  ;;  %205 = vmatprep.subr.bf16.mxu1 %v216_v3  ;;  %v226_v10 = vld [vmem:[%s294_s0 + $0x8] sm:$0xff]   ;;  %v27_v14 = vld [vmem:[%s295_s2] sm:$0x3]  ;;  %vm174_vm2 = vcmask 523268  }
   0x5   :  { %v31_v13 = vsub.s32 0, %v30_v12  ;;  %v35_v15 = vsub.s32 1, %v30_v12  ;;  %vm175_vm3 = vmor %vm174_vm2, %vm173_vm1 }
   0x7   :  { %99 = vmatpush1.bf16.msra.mxu0 %v218_v4  ;;  %209 = vmatpush1.bf16.msra.mxu1 %v218_v4  ;;  %v32_v16 = vrot.slane %v27_v14, %v31_v13  ;;  %v36_v17 = vrot.slane %v27_v14, %v35_v15 }
   0x8   :  { %100 = vmatprep.subr.bf16.mxu0 %v219_v5  ;;  %206 = vmatprep.subr.bf16.mxu1 %v219_v5 }
   0xb   :  { %101 = vmatpush1.bf16.msra.mxu0 %v221_v6  ;;  %210 = vmatpush1.bf16.msra.mxu1 %v221_v6 }
   0xc   :  { %102 = vmatprep.subr.bf16.mxu0 %v222_v7  ;;  %207 = vmatprep.subr.bf16.mxu1 %v222_v7 }
   0xf   :  { %103 = vmatpush1.bf16.msra.mxu0 %v224_v8  ;;  %211 = vmatpush1.bf16.msra.mxu1 %v224_v8 }
  0x12   :  { %194 = vmatmul.mubr.msk.bf16.vlgmr.msra.gmra.mrb[0].mxu0 %vm89_vm0, %v225_v9  ;;  %195 = vmatmul.mubr.msk.bf16.vlgmr.msra.gmra.mrb[0].mxu1 %vm89_vm0, %v226_v10 }
  0xe5   :  { %v130_v18 = vpop.f32.mrb[0].mxu0  ;;  %v140_v19 = vpop.f32.mrb[0].mxu1 }
  0xe6   :  { %v131_v20 = vadd.f32 %v130_v18, %v32_v16  ;;  %v141_v21 = vadd.f32 %v140_v19, %v32_v16  ;;  %v132_v22 = vpop.f32.mrb[1].mxu0  ;;  %v142_v23 = vpop.f32.mrb[1].mxu1 }
  0xe7   :  { %v133_v24 = vadd.f32 %v132_v22, %v36_v17  ;;  %v143_v25 = vadd.f32 %v142_v23, %v36_v17  ;;  %v134_v26 = vpop.f32.mrb[2].mxu0  ;;  %v144_v27 = vpop.f32.mrb[2].mxu1 }
  0xe8   :  { %v135_v28 = vadd.f32 %v134_v26, %v32_v16  ;;  %v145_v29 = vadd.f32 %v144_v27, %v32_v16  ;;  %v136_v30 = vpop.f32.mrb[3].mxu0  ;;  %v146_v31 = vpop.f32.mrb[3].mxu1 }
  0xe9   :  { %v200_v32 = vpack.c.bf16 %v133_v24, %v131_v20  ;;  %v202_v33 = vpack.c.bf16 %v143_v25, %v141_v21  ;;  %v137_v34 = vadd.f32 %v136_v30, %v36_v17  ;;  %v147_v35 = vadd.f32 %v146_v31, %v36_v17 }
  0xeb   :  { %176 = vst.msk [vmem:[%s296_s3] sm:$0xff] %vm175_vm3, %v200_v32  ;;  %178 = vst.msk [vmem:[%s296_s3 + $0x10] sm:$0xff] %vm175_vm3, %v202_v33  ;;  %v201_v36 = vpack.c.bf16 %v137_v34, %v135_v28  ;;  %v203_v37 = vpack.c.bf16 %v147_v35, %v145_v29 }
  0xed   :  { %177 = vst.msk [vmem:[%s296_s3 + $0x8] sm:$0xff] %vm175_vm3, %v201_v36  ;;  %179 = vst.msk [vmem:[%s296_s3 + $0x18] sm:$0xff] %vm175_vm3, %v203_v37 }

// kernel: bert_encoder_forward.11
= control target key start
LH: loop header
LB: loop body
LE: loop exit
PB: predicated region body
PF: predicated region fallthrough
CT: control target
= control target key end

     0   :  { %s1065_s9 = smov 0   ;;  %s1067_s10 = smov 0   ;;  %s1197_s0 = inlined_call_operand.vmem [shape: bf16[32,192], index: 0, kind: input, shape index: {}]   ;;  %s1198_s1 = inlined_call_operand.vmem [shape: bf16[2,16,16], index: 1, kind: input, shape index: {}]   ;;  %s1199_s2 = inlined_call_operand.vmem [shape: bf16[32,64], index: 2, kind: output, shape index: {}]  }
   0x1   :  { %s1069_s11 = smov 0  }
   0x2 LB: > { %s24_s12 = sadd.s32 1, %s1035_s10  ;;  %p855_p0 = scmp.ge.s32.totalorder %s1039_s11, 1  ;;  %s1039_s11 = sphi %s1069_s11, %s12_s11   ;;  %s1035_s10 = sphi %s1067_s10, %s1201_s10   ;;  %s1031_s9 = sphi %s1065_s9, %s1200_s9  }
   0x3   : > { %p26_p1 = scmp.ge.s32.totalorder %s24_s12, 2  ;;  %p145_p2 = scmp.lt.s32.totalorder %s1039_s11, 3 }
   0x5   : > { %s1203_s12 = smov (%p26_p1, %s24_s12), 0  ;;  %p146_p3 = pnand %p855_p0, %p145_p2 }
   0x6   : > { %s856_s13 = sshll.u32 (!%p146_p3), %s1031_s9, 1  ;;  %v1041_v0 = vmov (!%p146_p3), 0.0   ;;  %vm1042_vm0 = vmmov (!%p146_p3), 0   ;;  %s1043_s18 = smov (!%p146_p3), 64   ;;  %vm233_vm1 = vcmask (!%p146_p3), 130048   ;;  %vm483_vm2 = vcmask (!%p146_p3), 261248  }
   0x7   : > { %149 = sbr.rel (%p146_p3) target bundleno = 1620 (0x654), region = 28  ;;  %p179_p4 = scmp.lt.s32.totalorder (!%p146_p3), %s856_s13, 3  ;;  %902 = vmatprep.subr.bf16.mxu0 (!%p146_p3), %v1041_v0  ;;  %904 = vmatprep.mubr.msk.bf16.mxu0 (!%p146_p3), %vm1042_vm0, %v1041_v0  ;;  %vm615_vm3 = vcmask (!%p146_p3), 392448   ;;  %vm747_vm4 = vcmask (!%p146_p3), 523648   ;;  %vm760_vm5 = vcmask (!%p146_p3), 519168  }
   0x8   : > { %908 = vmatprep.subr.bf16.mxu1 (!%p146_p3), %v1041_v0  ;;  %910 = vmatprep.mubr.msk.bf16.mxu1 (!%p146_p3), %vm1042_vm0, %v1041_v0  ;;  %p186_p5 = scmp.lt.s32.totalorder (!%p146_p3), %s1031_s9, 1  ;;  %s1044_s23 = smov (!%p146_p3), 48  }
   0x9   : > { %s1045_s24 = smov (!%p146_p3), 96   ;;  %s1046_s25 = smov (!%p146_p3), 112  }
   0xa   : > { %s1047_s26 = smov (!%p146_p3), 32   ;;  %s1048_s27 = smov (!%p146_p3), 16  }
   0xb   : > { %s1049_s28 = smov (!%p146_p3), 80  }
   0xe   : > { %s1205_s13 = smov (!%p179_p4, %s856_s13), 3  ;;  %s1207_s9 = smov (!%p186_p5, %s1031_s9), 1 }
   0xf   : > { %s878_s14 = sshll.u32 %s1205_s13, 3  ;;  %s879_s19 = sshll.u32 %s1207_s9, 3 }
  0x10   : > { %s183_s17 = scalar_lea.vmem %s1197_s0, %s878_s14  ;;  %s193_s22 = scalar_lea.vmem %s1198_s1, %s879_s19 }
  0x11   : > { %v213_v1 = vld [vmem:[%s183_s17] sm:$0xff]  ;;  %v214_v2 = vld [vmem:[%s183_s17 + $0x8] sm:$0xff]  ;;  %s862_s29 = sshll.u32 %s1205_s13, 2 }
  0x12   : > { %v864_v3 = vcombine.low %v213_v1, %v214_v2  ;;  %v219_v6 = vmul.bf16 1048592000, %v213_v1  ;;  %v220_v7 = vmul.bf16 1048592000, %v214_v2  ;;  %v883_v9 = vld [vmem:[%s193_s22] sm:$0xff]   ;;  %v1120_v30 = vcombine.high %v213_v1, %v214_v2  ;;  %s200_s4 = scalar_lea.vmem %s1199_s2, %s862_s29 }
  0x13   : > { %v1108_v10 = vunpack.c.l.bf16 %v883_v9  ;;  %v1110_v11 = vunpack.c.h.bf16 %v883_v9 }
  0x14   : > { %231 = vrot.lane.b32.xlu0 %v864_v3, %s1043_s18  ;;  %v863_v8 = vcombine.low %v219_v6, %v220_v7  ;;  %909 = vmatpush3.bf16.msra.mxu1 %v1120_v30 }
  0x15   : > { %914 = vmatprep.subr.bf16.mxu1 %v1041_v0 }
  0x86   : > { %v232_v4 = vpop.permute.xlu0 %231 }
  0x87   : > { %v238_v5 = vsel %vm233_vm1, %v232_v4, 0 }
  0x88   : > { %903 = vmatpush3.bf16.xpose.msra.mxu0 %v238_v5 }
  0x89   : > { %920 = vmatprep.subr.bf16.mxu0 %v1041_v0 }
  0x8f   : > { %905 = vmatmul.mubr.msk.bf16.vlgmr.msra.gmra.mrb[0].mxu0 %vm233_vm1, %v863_v8 }
  0x90   : > { %922 = vmatprep.mubr.msk.bf16.mxu0 %vm1042_vm0, %v1041_v0 }
 0x162   : > { %v274_v12 = vpop.f32.mrb[0].mxu0 }
 0x163   : > { %v275_v13 = vadd.f32 %v1108_v10, %v274_v12  ;;  %v906_v14 = vpop.f32.mrb[1].mxu0 }
 0x164   : > { %v277_v15 = vpop.f32.mrb[2].mxu0 }
 0x165   : > { %v278_v16 = vadd.f32 %v1110_v11, %v277_v15  ;;  %v907_v17 = vpop.f32.mrb[3].mxu0  ;;  %v281_v18 = vsel %vm233_vm1, %v275_v13, -inf }
 0x166   : > { %282 = vmax.xlane.f32.xlu0 %v281_v18 }
 0x167   : > { %v284_v19 = vsel %vm233_vm1, %v278_v16, -inf }
 0x168   : > { %285 = vmax.xlane.f32.xlu1 %v284_v19 }
 0x179   : > { %356 = vrot.lane.b32.xlu1 %v864_v3, %s1044_s23 }
 0x17c   : > { %486 = vrot.lane.b32.xlu0 %v863_v8, %s1045_s24 }
 0x1f3   : > { %v283_v20 = vpop.xlane.xlu0 %282 }
 0x1f4   : > { %v287_v21 = vsub.f32 %v275_v13, %v283_v20 }
 0x1f5   : > { %v286_v22 = vpop.xlane.xlu1 %285 }
 0x1f6   : > { %v289_v23 = vmul.f32 1.442695, %v287_v21  ;;  %v288_v24 = vsub.f32 %v278_v16, %v286_v22 }
 0x1f7   : > { %v487_v44 = vpop.permute.xlu0 %486 }
 0x1f8   : > { %985 = vpow2.f32 %v289_v23  ;;  %v291_v25 = vmul.f32 1.442695, %v288_v24 }
 0x1f9   : > { %v357_v31 = vpop.permute.xlu1 %356 }
 0x1fa   : > { %987 = vpow2.f32 %v291_v25  ;;  %v362_v40 = vsel %vm233_vm1, %v357_v31, 0 }
 0x202   : > { %v986_v26 = vpop.eup %985 }
 0x203   : > { %v293_v27 = vsel %vm233_vm1, %v986_v26, 0.0 }
 0x204   : > { %v988_v28 = vpop.eup %987  ;;  %294 = vadd.xlane.f32.xlu1 %v293_v27 }
 0x205   : > { %v296_v29 = vsel %vm233_vm1, %v988_v28, 0.0 }
 0x208   : > { %297 = vadd.xlane.f32.xlu1 %v296_v29 }
 0x219   : > { %354 = vrot.lane.b32.xlu1 %v863_v8, %s1046_s25 }
 0x21d   : > { %488 = vrot.lane.b32.xlu1 %v864_v3, %s1047_s26 }
 0x221   : > { %620 = vrot.lane.b32.xlu1 %v864_v3, %s1048_s27 }
 0x225   : > { %618 = vrot.lane.b32.xlu1 %v863_v8, %s1049_s28 }
 0x291   : > { %v295_v32 = vpop.xlane.xlu1 %294 }
 0x292   : > { %989 = vrcp.f32 %v295_v32 }
 0x295   : > { %v298_v33 = vpop.xlane.xlu1 %297 }
 0x296   : > { %991 = vrcp.f32 %v298_v33 }
 0x299   : > { %v355_v38 = vpop.permute.xlu1 %354 }
 0x29c   : > { %v990_v34 = vpop.eup %989 }
 0x29d   : > { %v301_v36 = vmul.f32 %v990_v34, %v986_v26  ;;  %v489_v41 = vpop.permute.xlu1 %488 }
 0x29e   : > { %v494_v42 = vsel %vm233_vm1, %v489_v41, 0 }
 0x2a0   : > { %v992_v35 = vpop.eup %991 }
 0x2a1   : > { %v302_v37 = vmul.f32 %v992_v35, %v988_v28  ;;  %v621_v43 = vpop.permute.xlu1 %620 }
 0x2a2   : > { %v626_v45 = vsel %vm233_vm1, %v621_v43, 0 }
 0x2a3   : > { %v303_v39 = vpack.c.bf16 %v302_v37, %v301_v36 }
 0x2a5   : > { %911 = vmatmul.mubr.msk.bf16.vlgmr.msra.gmra.mrb[0].mxu1 %vm233_vm1, %v303_v39  ;;  %v619_v46 = vpop.permute.xlu1 %618 }
 0x2a6   : > { %915 = vmatpush3.bf16.xpose.msra.mxu1 %v362_v40  ;;  %916 = vmatprep.mubr.msk.bf16.mxu1 %vm1042_vm0, %v1041_v0 }
 0x2a7   : > { %926 = vmatprep.subr.bf16.mxu1 %v1041_v0 }
 0x2ad   : > { %917 = vmatmul.mubr.msk.bf16.vlgmr.msra.gmra.mrb[4].mxu1 %vm233_vm1, %v355_v38 }
 0x2ae   : > { %927 = vmatpush3.bf16.xpose.msra.mxu1 %v494_v42  ;;  %928 = vmatprep.mubr.msk.bf16.mxu1 %vm1042_vm0, %v1041_v0 }
 0x2af   : > { %938 = vmatprep.subr.bf16.mxu1 %v1041_v0 }
 0x2b5   : > { %929 = vmatmul.mubr.msk.bf16.vlgmr.msra.gmra.mrb[8].mxu1 %vm233_vm1, %v487_v44 }
 0x2b6   : > { %939 = vmatpush3.bf16.xpose.msra.mxu1 %v626_v45  ;;  %940 = vmatprep.mubr.msk.bf16.mxu1 %vm1042_vm0, %v1041_v0 }
 0x2bd   : > { %941 = vmatmul.mubr.msk.bf16.vlgmr.msra.gmra.mrb[12].mxu1 %vm233_vm1, %v619_v46 }
 0x378   : > { %v345_v47 = vpop.f32.mrb[0].mxu1 }
 0x379   : > { %352 = vst.msk [vmem:[#allocation2] sm:$0xff] %vm233_vm1, %v345_v47  ;;  %v912_v48 = vpop.f32.mrb[1].mxu1 }
 0x37a   : > { %v348_v49 = vpop.f32.mrb[2].mxu1 }
 0x37b   : > { %353 = vst.msk [vmem:[#allocation2 + $0x8] sm:$0xff] %vm233_vm1, %v348_v49  ;;  %v913_v50 = vpop.f32.mrb[3].mxu1 }
 0x380   : > { %v398_v51 = vpop.f32.mrb[4].mxu1 }
 0x381   : > { %v399_v52 = vadd.f32 %v1108_v10, %v398_v51  ;;  %v918_v53 = vpop.f32.mrb[5].mxu1 }
 0x382   : > { %v401_v54 = vpop.f32.mrb[6].mxu1 }
 0x383   : > { %v402_v55 = vadd.f32 %v1110_v11, %v401_v54  ;;  %v919_v56 = vpop.f32.mrb[7].mxu1  ;;  %v405_v57 = vsel %vm233_vm1, %v399_v52, -inf }
 0x384   : > { %406 = vmax.xlane.f32.xlu1 %v405_v57 }
 0x385   : > { %v408_v58 = vsel %vm233_vm1, %v402_v55, -inf }
 0x386   : > { %409 = vmax.xlane.f32.xlu0 %v408_v58 }
 0x388   : > { %v530_v59 = vpop.f32.mrb[8].mxu1 }
 0x389   : > { %v531_v60 = vadd.f32 %v1108_v10, %v530_v59  ;;  %v930_v61 = vpop.f32.mrb[9].mxu1 }
 0x38a   : > { %v533_v62 = vpop.f32.mrb[10].mxu1 }
 0x38b   : > { %v534_v63 = vadd.f32 %v1110_v11, %v533_v62  ;;  %v931_v1 = vpop.f32.mrb[11].mxu1  ;;  %v537_v2 = vsel %vm233_vm1, %v531_v60, -inf }
 0x38c   : > { %538 = vmax.xlane.f32.xlu1 %v537_v2 }
 0x38d   : > { %v540_v3 = vsel %vm233_vm1, %v534_v63, -inf }
 0x390   : > { %541 = vmax.xlane.f32.xlu1 %v540_v3  ;;  %v662_v4 = vpop.f32.mrb[12].mxu1 }
 0x391   : > { %v663_v5 = vadd.f32 %v1108_v10, %v662_v4  ;;  %v942_v6 = vpop.f32.mrb[13].mxu1 }
 0x392   : > { %v665_v7 = vpop.f32.mrb[14].mxu1 }
 0x393   : > { %v666_v8 = vadd.f32 %v1110_v11, %v665_v7  ;;  %v669_v9 = vsel %vm233_vm1, %v663_v5, -inf  ;;  %v943_v12 = vpop.f32.mrb[15].mxu1 }
 0x394   : > { %670 = vmax.xlane.f32.xlu0 %v669_v9 }
 0x395   : > { %v672_v13 = vsel %vm233_vm1, %v666_v8, -inf }
 0x396   : > { %673 = vmax.xlane.f32.xlu1 %v672_v13 }
 0x411   : > { %v407_v14 = vpop.xlane.xlu1 %406 }
 0x412   : > { %v411_v15 = vsub.f32 %v399_v52, %v407_v14 }
 0x413   : > { %v410_v16 = vpop.xlane.xlu0 %409 }
 0x414   : > { %v413_v17 = vmul.f32 1.442695, %v411_v15  ;;  %v412_v18 = vsub.f32 %v402_v55, %v410_v16 }
 0x416   : > { %993 = vpow2.f32 %v413_v17  ;;  %v415_v19 = vmul.f32 1.442695, %v412_v18 }
 0x418   : > { %995 = vpow2.f32 %v415_v19 }
 0x419   : > { %v539_v10 = vpop.xlane.xlu1 %538 }
 0x41a   : > { %v543_v20 = vsub.f32 %v531_v60, %v539_v10 }
 0x41c   : > { %v545_v21 = vmul.f32 1.442695, %v543_v20 }
 0x41d   : > { %v542_v22 = vpop.xlane.xlu1 %541 }
 0x41e   : > { %997 = vpow2.f32 %v545_v21  ;;  %v544_v11 = vsub.f32 %v534_v63, %v542_v22 }
 0x420   : > { %v994_v23 = vpop.eup %993  ;;  %v547_v24 = vmul.f32 1.442695, %v544_v11 }
 0x421   : > { %v671_v25 = vpop.xlane.xlu0 %670  ;;  %v417_v26 = vsel %vm233_vm1, %v994_v23, 0.0 }
 0x422   : > { %v996_v27 = vpop.eup %995  ;;  %999 = vpow2.f32 %v547_v24  ;;  %v675_v28 = vsub.f32 %v663_v5, %v671_v25  ;;  %418 = vadd.xlane.f32.xlu0 %v417_v26 }
 0x423   : > { %v420_v29 = vsel %vm233_vm1, %v996_v27, 0.0  ;;  %v674_v38 = vpop.xlane.xlu1 %673 }
 0x424   : > { %v677_v31 = vmul.f32 1.442695, %v675_v28  ;;  %421 = vadd.xlane.f32.xlu1 %v420_v29  ;;  %v676_v39 = vsub.f32 %v666_v8, %v674_v38 }
 0x426   : > { %1001 = vpow2.f32 %v677_v31  ;;  %v679_v40 = vmul.f32 1.442695, %v676_v39 }
 0x428   : > { %v998_v32 = vpop.eup %997  ;;  %1003 = vpow2.f32 %v679_v40 }
 0x429   : > { %v549_v33 = vsel %vm233_vm1, %v998_v32, 0.0 }
 0x42a   : > { %550 = vadd.xlane.f32.xlu0 %v549_v33 }
 0x42c   : > { %v1000_v34 = vpop.eup %999 }
 0x42d   : > { %v552_v35 = vsel %vm233_vm1, %v1000_v34, 0.0 }
 0x42e   : > { %553 = vadd.xlane.f32.xlu1 %v552_v35 }
 0x430   : > { %v1002_v36 = vpop.eup %1001 }
 0x431   : > { %v681_v37 = vsel %vm233_vm1, %v1002_v36, 0.0 }
 0x432   : > { %682 = vadd.xlane.f32.xlu0 %v681_v37  ;;  %v1004_v41 = vpop.eup %1003 }
 0x433   : > { %v684_v42 = vsel %vm233_vm1, %v1004_v41, 0.0 }
 0x43f   : > { %560 = vrot.lane.b32.xlu1 %v1120_v30, %s1045_s24 }
 0x448   : > { %428 = vrot.lane.b32.xlu0 %v1120_v30, %s1046_s25 }
 0x463   : > { %685 = vadd.xlane.f32.xlu1 %v684_v42 }
 0x474   : > { %692 = vrot.lane.b32.xlu1 %v1120_v30, %s1049_s28 }
 0x4af   : > { %v419_v44 = vpop.xlane.xlu0 %418 }
 0x4b1   : > { %v422_v43 = vpop.xlane.xlu1 %421 }
 0x4b2   : > { %1005 = vrcp.f32 %v422_v43 }
 0x4b3   : > { %1007 = vrcp.f32 %v419_v44 }
 0x4b7   : > { %v551_v45 = vpop.xlane.xlu0 %550 }
 0x4bb   : > { %v554_v46 = vpop.xlane.xlu1 %553 }
 0x4bc   : > { %1009 = vrcp.f32 %v554_v46  ;;  %v1006_v47 = vpop.eup %1005 }
 0x4bd   : > { %1011 = vrcp.f32 %v551_v45  ;;  %v1008_v49 = vpop.eup %1007  ;;  %v426_v50 = vmul.f32 %v1006_v47, %v996_v27 }
 0x4be   : > { %v425_v51 = vmul.f32 %v1008_v49, %v994_v23 }
 0x4bf   : > { %v683_v48 = vpop.xlane.xlu0 %682  ;;  %v561_v30 = vpop.permute.xlu1 %560 }
 0x4c0   : > { %v427_v53 = vpack.c.bf16 %v426_v50, %v425_v51  ;;  %1013 = vrcp.f32 %v683_v48 }
 0x4c3   : > { %v429_v52 = vpop.permute.xlu0 %428 }
 0x4c4   : > { %921 = vmatpush3.bf16.msra.mxu0 %v429_v52 }
 0x4c5   : > { %932 = vmatprep.subr.bf16.mxu0 %v1041_v0 }
 0x4c6   : > { %v1010_v54 = vpop.eup %1009 }
 0x4c7   : > { %923 = vmatmul.mubr.msk.bf16.vlgmr.msra.gmra.mrb[4].mxu0 %vm233_vm1, %v427_v53  ;;  %v1012_v55 = vpop.eup %1011  ;;  %v558_v56 = vmul.f32 %v1010_v54, %v1000_v34 }
 0x4c8   : > { %933 = vmatpush3.bf16.msra.mxu0 %v561_v30  ;;  %934 = vmatprep.mubr.msk.bf16.mxu0 %vm1042_vm0, %v1041_v0  ;;  %v557_v57 = vmul.f32 %v1012_v55, %v998_v32 }
 0x4c9   : > { %944 = vmatprep.subr.bf16.mxu0 %v1041_v0 }
 0x4ca   : > { %v559_v58 = vpack.c.bf16 %v558_v56, %v557_v57  ;;  %v1014_v61 = vpop.eup %1013 }
 0x4cb   : > { %v689_v63 = vmul.f32 %v1014_v61, %v1002_v36 }
 0x4cf   : > { %935 = vmatmul.mubr.msk.bf16.vlgmr.msra.gmra.mrb[8].mxu0 %vm233_vm1, %v559_v58 }
 0x4d0   : > { %946 = vmatprep.mubr.msk.bf16.mxu0 %vm1042_vm0, %v1041_v0 }
 0x4f0   : > { %v686_v59 = vpop.xlane.xlu1 %685 }
 0x4f1   : > { %1015 = vrcp.f32 %v686_v59 }
 0x4f4   : > { %v693_v60 = vpop.permute.xlu1 %692 }
 0x4f5   : > { %945 = vmatpush3.bf16.msra.mxu0 %v693_v60 }
 0x4fb   : > { %v1016_v62 = vpop.eup %1015 }
 0x4fc   : > { %v690_v1 = vmul.f32 %v1016_v62, %v1004_v41 }
 0x4fe   : > { %v691_v2 = vpack.c.bf16 %v690_v1, %v689_v63 }
 0x500   : > { %947 = vmatmul.mubr.msk.bf16.vlgmr.msra.gmra.mrb[12].mxu0 %vm233_vm1, %v691_v2 }
 0x59a   : > { %v468_v3 = vpop.f32.mrb[4].mxu0 }
 0x59b   : > { %477 = vrot.lane.b32.xlu0 %v468_v3, %s1048_s27  ;;  %v924_v4 = vpop.f32.mrb[5].mxu0 }
 0x59c   : > { %v471_v5 = vpop.f32.mrb[6].mxu0 }
 0x59d   : > { %479 = vrot.lane.b32.xlu1 %v471_v5, %s1048_s27  ;;  %v925_v0 = vpop.f32.mrb[7].mxu0 }
 0x5a2   : > { %v600_v6 = vpop.f32.mrb[8].mxu0 }
 0x5a3   : > { %609 = vrot.lane.b32.xlu0 %v600_v6, %s1047_s26  ;;  %v936_v7 = vpop.f32.mrb[9].mxu0 }
 0x5a4   : > { %v603_v8 = vpop.f32.mrb[10].mxu0 }
 0x5a5   : > { %611 = vrot.lane.b32.xlu1 %v603_v8, %s1047_s26  ;;  %v937_v9 = vpop.f32.mrb[11].mxu0 }
 0x5d3   : > { %v732_v12 = vpop.f32.mrb[12].mxu0 }
 0x5d4   : > { %741 = vrot.lane.b32.xlu0 %v732_v12, %s1044_s23  ;;  %v948_v13 = vpop.f32.mrb[13].mxu0 }
 0x5d5   : > { %v735_v14 = vpop.f32.mrb[14].mxu0 }
 0x5d6   : > { %743 = vrot.lane.b32.xlu1 %v735_v14, %s1044_s23  ;;  %v949_v15 = vpop.f32.mrb[15].mxu0 }
 0x60d   : > { %v478_v16 = vpop.permute.xlu0 %477 }
 0x60e   : > { %484 = vst.msk [vmem:[#allocation2] sm:$0xff] %vm483_vm2, %v478_v16 }
 0x60f   : > { %v480_v17 = vpop.permute.xlu1 %479 }
 0x610   : > { %485 = vst.msk [vmem:[#allocation2 + $0x8] sm:$0xff] %vm483_vm2, %v480_v17 }
 0x615   : > { %v610_v18 = vpop.permute.xlu0 %609 }
 0x616   : > { %616 = vst.msk [vmem:[#allocation2] sm:$0xff] %vm615_vm3, %v610_v18 }
 0x617   : > { %v612_v19 = vpop.permute.xlu1 %611 }
 0x618   : > { %617 = vst.msk [vmem:[#allocation2 + $0x8] sm:$0xff] %vm615_vm3, %v612_v19 }
 0x646   : > { %v742_v10 = vpop.permute.xlu0 %741 }
 0x647   : > { %748 = vst.msk [vmem:[#allocation2] sm:$0xff] %vm747_vm4, %v742_v10 }
 0x648   : > { %v744_v20 = vpop.permute.xlu1 %743 }
 0x649   : > { %749 = vst.msk [vmem:[#allocation2 + $0x8] sm:$0xff] %vm747_vm4, %v744_v20 }
 0x64e   : > { %v750_v21 = vld [vmem:[#allocation2] sm:$0xff] }
 0x64f   : > { %v880_v22 = vpack.c.bf16 %v750_v21, %v750_v21 }
 0x650   : > { %v751_v11 = vld [vmem:[#allocation2 + $0x8] sm:$0xff] }
 0x651   : > { %761 = vst.msk [vmem:[%s200_s4] sm:$0xf] %vm760_vm5, %v880_v22  ;;  %v881_v23 = vpack.c.bf16 %v751_v11, %v751_v11 }
 0x653   : > { %762 = vst.msk [vmem:[%s200_s4 + $0x4] sm:$0xf] %vm760_vm5, %v881_v23 }
 0x654 PF: > { %s12_s11 = sadd.s32 1, %s1039_s11   ;;  %s1200_s9 = smov %s1035_s10 }
 0x655   : > { %p9_p6 = scmp.ge.s32.totalorder %s12_s11, 4   ;;  %s1201_s10 = smov %s1203_s12 }
 0x657   :  { %11 = sbr.rel (!%p9_p6) target bundleno = 2 (0x2), region = 62 }

// kernel: bert_encoder_forward.14
= control target key start
LH: loop header
LB: loop body
LE: loop exit
PB: predicated region body
PF: predicated region fallthrough
CT: control target
= control target key end

     0   :  { %vm244_vm0 = vcmask 523264   ;;  %vm336_vm1 = vcmask 519168   ;;  %s593_s1 = inlined_call_operand.vmem [shape: bf16[256,64], index: 1, kind: input, shape index: {}]   ;;  %s594_s0 = inlined_call_operand.vmem [shape: bf16[32,256], index: 0, kind: input, shape index: {}]   ;;  %s595_s3 = inlined_call_operand.vmem [shape: bf16[32,64], index: 3, kind: input, shape index: {}]   ;;  %s596_s2 = inlined_call_operand.vmem [shape: f32[1,64], index: 2, kind: input, shape index: {}, may-alias: {2,5}]   ;;  %s597_s4 = inlined_call_operand.vmem [shape: f32[1,64], index: 4, kind: input, shape index: {}]   ;;  %s598_s5 = inlined_call_operand.vmem [shape: f32[1,64], index: 5, kind: input, shape index: {}, may-alias: {2,5}]   ;;  %s599_s6 = inlined_call_operand.vmem [shape: bf16[32,64], index: 6, kind: output, shape index: {}]  }
   0x1   :  { %v429_v0 = vld [vmem:[%s593_s1 + $0x40] sm:$0xff]   ;;  %v431_v2 = vld [vmem:[%s593_s1 + $0x48] sm:$0xff]   ;;  %v433_v4 = vld [vmem:[%s593_s1 + $0x50] sm:$0xff]  }
   0x2   :  { %v430_v1 = vld [vmem:[%s593_s1] sm:$0xff]   ;;  %385 = vmatprep.subr.bf16.mxu0 %v429_v0  ;;  %413 = vmatprep.subr.bf16.mxu1 %v429_v0  ;;  %v432_v3 = vld [vmem:[%s593_s1 + $0x8] sm:$0xff]   ;;  %v434_v5 = vld [vmem:[%s593_s1 + $0x10] sm:$0xff]  }
   0x3   :  { %386 = vmatpush3.bf16.msra.mxu0 %v430_v1  ;;  %421 = vmatpush3.bf16.msra.mxu1 %v430_v1  ;;  %v435_v6 = vld [vmem:[%s593_s1 + $0x58] sm:$0xff]   ;;  %v437_v8 = vld [vmem:[%s593_s1 + $0x60] sm:$0xff]   ;;  %v439_v10 = vld [vmem:[%s593_s1 + $0x68] sm:$0xff]  }
   0x4   :  { %387 = vmatprep.subr.bf16.mxu0 %v431_v2  ;;  %414 = vmatprep.subr.bf16.mxu1 %v431_v2  ;;  %v436_v7 = vld [vmem:[%s593_s1 + $0x18] sm:$0xff]   ;;  %v438_v9 = vld [vmem:[%s593_s1 + $0x20] sm:$0xff]   ;;  %v440_v13 = vld [vmem:[%s593_s1 + $0x28] sm:$0xff]  }
   0x5   :  { %v447_v11 = vld [vmem:[%s594_s0 + $0x4] ss:$8 sps:$4 sm:$0xff]   ;;  %v450_v12 = vld [vmem:[%s594_s0 + $0x14] ss:$8 sps:$4 sm:$0xff]   ;;  %v445_v18 = vld [vmem:[%s594_s0] ss:$8 sps:$4 sm:$0xff]  }
   0x6   :  { %v441_v14 = vld [vmem:[%s593_s1 + $0x70] sm:$0xff]   ;;  %215 = vmatprep.mubr.bf16.mxu0 %v447_v11  ;;  %223 = vmatprep.mubr.bf16.mxu1 %v450_v12  ;;  %v443_v16 = vld [vmem:[%s593_s1 + $0x78] sm:$0xff]   ;;  %v384_v20 = vld [vmem:[%s595_s3 + $0x8] sm:$0xff]  }
   0x7   :  { %388 = vmatpush3.bf16.msra.mxu0 %v432_v3  ;;  %422 = vmatpush3.bf16.msra.mxu1 %v432_v3  ;;  %v442_v15 = vld [vmem:[%s593_s1 + $0x30] sm:$0xff]   ;;  %v444_v17 = vld [vmem:[%s593_s1 + $0x38] sm:$0xff]   ;;  %v377_v21 = vld [vmem:[%s595_s3] sm:$0xff]   ;;  %v382_v31 = vunpack.c.l.bf16 %v384_v20  ;;  %v383_v35 = vunpack.c.h.bf16 %v384_v20 }
   0x8   :  { %389 = vmatprep.subr.bf16.mxu0 %v433_v4  ;;  %415 = vmatprep.subr.bf16.mxu1 %v433_v4  ;;  %v448_v19 = vld [vmem:[%s594_s0 + $0x10] ss:$8 sps:$4 sm:$0xff]   ;;  %v345_v24 = vld [vmem:[%s596_s2] ss:$0 sm:$0xff]  ;;  %v378_v32 = vunpack.c.l.bf16 %v377_v21  ;;  %v379_v36 = vunpack.c.h.bf16 %v377_v21 }
   0x9   :  { %v366_v20 = vld [vmem:[%s597_s4] ss:$0 sm:$0xff] }
   0xb   :  { %390 = vmatpush3.bf16.msra.mxu0 %v434_v5  ;;  %423 = vmatpush3.bf16.msra.mxu1 %v434_v5 }
   0xc   :  { %391 = vmatprep.subr.bf16.mxu0 %v435_v6  ;;  %416 = vmatprep.subr.bf16.mxu1 %v435_v6 }
   0xf   :  { %392 = vmatpush3.bf16.msra.mxu0 %v436_v7  ;;  %424 = vmatpush3.bf16.msra.mxu1 %v436_v7 }
  0x10   :  { %393 = vmatprep.subr.bf16.mxu0 %v437_v8  ;;  %417 = vmatprep.subr.bf16.mxu1 %v437_v8 }
  0x13   :  { %394 = vmatpush3.bf16.msra.mxu0 %v438_v9  ;;  %425 = vmatpush3.bf16.msra.mxu1 %v438_v9 }
  0x14   :  { %395 = vmatprep.subr.bf16.mxu0 %v439_v10  ;;  %418 = vmatprep.subr.bf16.mxu1 %v439_v10 }
  0x17   :  { %396 = vmatpush3.bf16.msra.mxu0 %v440_v13  ;;  %426 = vmatpush3.bf16.msra.mxu1 %v440_v13 }
  0x18   :  { %397 = vmatprep.subr.bf16.mxu0 %v441_v14  ;;  %419 = vmatprep.subr.bf16.mxu1 %v441_v14 }
  0x1b   :  { %398 = vmatpush3.bf16.msra.mxu0 %v442_v15  ;;  %427 = vmatpush3.bf16.msra.mxu1 %v442_v15 }
  0x1c   :  { %399 = vmatprep.subr.bf16.mxu0 %v443_v16  ;;  %420 = vmatprep.subr.bf16.mxu1 %v443_v16 }
  0x1f   :  { %400 = vmatpush3.bf16.msra.mxu0 %v444_v17  ;;  %428 = vmatpush3.bf16.msra.mxu1 %v444_v17 }
  0x22   :  { %216 = vmatmul.mubr.bf16.vlgmr.msra.gmra.mrb[0].mxu0 %v445_v18  ;;  %224 = vmatmul.mubr.bf16.vlgmr.msra.gmra.mrb[0].mxu1 %v448_v19 }
  0xf5   :  { %v401_v22 = vpop.f32.mrb[0].mxu0  ;;  %v407_v23 = vpop.f32.mrb[0].mxu1 }
  0xf6   :  { %v402_v25 = vpop.f32.mrb[1].mxu0  ;;  %v408_v26 = vpop.f32.mrb[1].mxu1 }
  0xf7   :  { %v403_v27 = vadd.f32 %v402_v25, %v401_v22  ;;  %v409_v28 = vadd.f32 %v408_v26, %v407_v23  ;;  %v404_v29 = vpop.f32.mrb[2].mxu0  ;;  %v410_v30 = vpop.f32.mrb[2].mxu1  ;;  %v367_v22 = vld [vmem:[%s598_s5] ss:$0 sm:$0xff] }
  0xf8   :  { %v405_v33 = vpop.f32.mrb[3].mxu0  ;;  %v411_v34 = vpop.f32.mrb[3].mxu1 }
  0xf9   :  { %v218_v37 = vadd.f32 %v403_v27, %v345_v24  ;;  %v226_v38 = vadd.f32 %v409_v28, %v345_v24  ;;  %v406_v39 = vadd.f32 %v405_v33, %v404_v29  ;;  %v412_v40 = vadd.f32 %v411_v34, %v410_v30 }
  0xfb   :  { %v221_v41 = vadd.f32 %v406_v39, %v345_v24  ;;  %v229_v42 = vadd.f32 %v412_v40, %v345_v24  ;;  %v242_v43 = vadd.f32 %v382_v31, %v226_v38  ;;  %v240_v44 = vadd.f32 %v378_v32, %v218_v37 }
  0xfd   :  { %v251_v45 = vsel %vm244_vm0, %v242_v43, 0.0  ;;  %v245_v46 = vsel %vm244_vm0, %v240_v44, 0.0  ;;  %v243_v47 = vadd.f32 %v383_v35, %v229_v42  ;;  %v241_v48 = vadd.f32 %v379_v36, %v221_v41 }
  0xfe   :  { %252 = vadd.xlane.f32.xlu1 %v251_v45  ;;  %246 = vadd.xlane.f32.xlu0 %v245_v46 }
  0xff   :  { %v254_v49 = vsel %vm244_vm0, %v243_v47, 0.0  ;;  %v248_v50 = vsel %vm244_vm0, %v241_v48, 0.0 }
 0x102   :  { %255 = vadd.xlane.f32.xlu1 %v254_v49  ;;  %249 = vadd.xlane.f32.xlu0 %v248_v50 }
 0x18b   :  { %v253_v51 = vpop.xlane.xlu1 %252  ;;  %v247_v52 = vpop.xlane.xlu0 %246 }
 0x18c   :  { %v260_v53 = vmul.f32 0.015625, %v253_v51  ;;  %v258_v54 = vmul.f32 0.015625, %v247_v52 }
 0x18e   :  { %v264_v55 = vsub.f32 %v242_v43, %v260_v53  ;;  %v262_v56 = vsub.f32 %v240_v44, %v258_v54 }
 0x18f   :  { %v256_v57 = vpop.xlane.xlu1 %255  ;;  %v250_v58 = vpop.xlane.xlu0 %249 }
 0x190   :  { %v261_v59 = vmul.f32 0.015625, %v256_v57  ;;  %v259_v60 = vmul.f32 0.015625, %v250_v58  ;;  %v266_v61 = vmul.f32 %v262_v56, %v262_v56  ;;  %v268_v1 = vmul.f32 %v264_v55, %v264_v55 }
 0x192   :  { %v265_v62 = vsub.f32 %v243_v47, %v261_v59  ;;  %v263_v63 = vsub.f32 %v241_v48, %v259_v60  ;;  %v270_v0 = vsel %vm244_vm0, %v266_v61, 0.0  ;;  %v276_v3 = vsel %vm244_vm0, %v268_v1, 0.0 }
 0x193   :  { %271 = vadd.xlane.f32.xlu0 %v270_v0 }
 0x194   :  { %v267_v2 = vmul.f32 %v263_v63, %v263_v63  ;;  %v269_v5 = vmul.f32 %v265_v62, %v265_v62 }
 0x196   :  { %v273_v4 = vsel %vm244_vm0, %v267_v2, 0.0  ;;  %v279_v6 = vsel %vm244_vm0, %v269_v5, 0.0 }
 0x197   :  { %277 = vadd.xlane.f32.xlu0 %v276_v3  ;;  %274 = vadd.xlane.f32.xlu1 %v273_v4 }
 0x19b   :  { %280 = vadd.xlane.f32.xlu1 %v279_v6 }
 0x220   :  { %v272_v7 = vpop.xlane.xlu0 %271 }
 0x221   :  { %v282_v8 = vmul.f32 0.015625, %v272_v7 }
 0x223   :  { %v286_v9 = vadd.f32 1e-12, %v282_v8 }
 0x224   :  { %v275_v10 = vpop.xlane.xlu1 %274  ;;  %v278_v11 = vpop.xlane.xlu0 %277 }
 0x225   :  { %451 = vrsqrt.f32 %v286_v9  ;;  %v283_v12 = vmul.f32 0.015625, %v275_v10  ;;  %v284_v13 = vmul.f32 0.015625, %v278_v11 }
 0x227   :  { %v287_v14 = vadd.f32 1e-12, %v283_v12  ;;  %v288_v15 = vadd.f32 1e-12, %v284_v13 }
 0x228   :  { %v281_v16 = vpop.xlane.xlu1 %280 }
 0x229   :  { %453 = vrsqrt.f32 %v287_v14  ;;  %v285_v17 = vmul.f32 0.015625, %v281_v16 }
 0x22a   :  { %455 = vrsqrt.f32 %v288_v15 }
 0x22b   :  { %v289_v18 = vadd.f32 1e-12, %v285_v17 }
 0x22d   :  { %457 = vrsqrt.f32 %v289_v18 }
 0x22f   :  { %v452_v19 = vpop.eup %451 }
 0x230   :  { %v294_v21 = vmul.f32 %v452_v19, %v262_v56 }
 0x232   :  { %v305_v23 = vmul.f32 %v366_v20, %v294_v21 }
 0x233   :  { %v454_v24 = vpop.eup %453 }
 0x234   :  { %v456_v25 = vpop.eup %455  ;;  %v316_v26 = vadd.f32 %v367_v22, %v305_v23  ;;  %v295_v27 = vmul.f32 %v454_v24, %v263_v63 }
 0x235   :  { %v296_v28 = vmul.f32 %v456_v25, %v264_v55 }
 0x236   :  { %v372_v29 = vpack.c.bf16 %v316_v26, %v316_v26  ;;  %v306_v30 = vmul.f32 %v366_v20, %v295_v27 }
 0x237   :  { %v458_v31 = vpop.eup %457  ;;  %v307_v32 = vmul.f32 %v366_v20, %v296_v28 }
 0x238   :  { %337 = vst.msk [vmem:[%s599_s6] sm:$0xf] %vm336_vm1, %v372_v29  ;;  %v317_v33 = vadd.f32 %v367_v22, %v306_v30  ;;  %v297_v34 = vmul.f32 %v458_v31, %v265_v62 }
 0x239   :  { %v318_v35 = vadd.f32 %v367_v22, %v307_v32 }
 0x23a   :  { %v373_v36 = vpack.c.bf16 %v317_v33, %v317_v33  ;;  %v308_v37 = vmul.f32 %v366_v20, %v297_v34 }
 0x23b   :  { %v374_v38 = vpack.c.bf16 %v318_v35, %v318_v35 }
 0x23c   :  { %338 = vst.msk [vmem:[%s599_s6 + $0x4] sm:$0xf] %vm336_vm1, %v373_v36  ;;  %v319_v39 = vadd.f32 %v367_v22, %v308_v37 }
 0x23d   :  { %339 = vst.msk [vmem:[%s599_s6 + $0x8] sm:$0xf] %vm336_vm1, %v374_v38 }
 0x23e   :  { %v375_v40 = vpack.c.bf16 %v319_v39, %v319_v39 }
 0x240   :  { %340 = vst.msk [vmem:[%s599_s6 + $0xc] sm:$0xf] %vm336_vm1, %v375_v40 }

</bundles_post_ra>
